<compile_context>
chip_gen: v7x
topology: tpu7x:2x2x1
jax: 0.10.0
libtpu: 0.0.40
codegen_flags: <defaults>
</compile_context>

<pallas_src>
import functools
import math

import jax
import jax.numpy as jnp
from jax import lax
from jax.experimental import pallas as pl
from jax.experimental.pallas import tpu as pltpu

SCALE = math.sqrt(0.5)  # torch.sqrt(FloatTensor([0.5]))


def _round_up(x, m):
    return ((x + m - 1) // m) * m


# ----------------------------- fused decoder kernel ---------------------------
def decoder_kernel(ids_ref,                          # SMEM [B, T] int32 (prefetch)
                   pos_emb_ref, tok_emb_ref,         # [T, E], [V, E]
                   enc_conved_t_ref, enc_combined_ref,  # [E, S_pad], [S_pad, E]
                   e2h_w_ref, e2h_b_ref,
                   conv_w_ref, conv_b_ref,           # [L, k, H, 2H], [L, 1, 2H]
                   ah2e_w_ref, ah2e_b_ref,
                   ae2h_w_ref, ae2h_b_ref,
                   w_out_ref, b_out_ref,             # [H, V_pad], [1, V_pad]
                   out_ref, attn_ref,                # [T, V_pad], [T, S_pad]
                   emb_scratch, xpad_scratch,        # VMEM [T, E], [T+k-1, H]
                   *, pad_val, n_src):
    f32 = jnp.float32
    b = pl.program_id(0)
    T, E = pos_emb_ref.shape
    H = e2h_w_ref.shape[1]
    n_layers, k = conv_w_ref.shape[0], conv_w_ref.shape[1]
    S_pad = enc_combined_ref.shape[0]

    # ---- token embedding gather: ids from SMEM, rows via dynamic slices -----
    for t in range(T):
        idx = ids_ref[b, t]
        emb_scratch[pl.ds(t, 1), :] = tok_emb_ref[pl.ds(idx, 1), :]
    embedded = emb_scratch[...] + pos_emb_ref[...]                    # [T, E]

    # ---- emb2hid -------------------------------------------------------------
    x = jnp.dot(embedded, e2h_w_ref[...],
                preferred_element_type=f32) + e2h_b_ref[...]          # [T, H]

    enc_conved_t = enc_conved_t_ref[...]                              # [E, S_pad]
    enc_combined = enc_combined_ref[...]                              # [S_pad, E]

    # ---- loop-invariant work hoisted out of the layer loop -------------------
    # causal left-pad rows (value trg_pad_idx) written once into the scratch
    xpad_scratch[0:k - 1, :] = jnp.full((k - 1, H), pad_val, dtype=f32)
    # additive mask hiding the zero-padded source positions in the softmax
    src_mask = jnp.where(
        lax.broadcasted_iota(jnp.int32, (T, S_pad), 1) < n_src,
        0.0, -1e30).astype(f32)                                       # [T, S_pad]

    attention = None
    for layer in range(n_layers):       # static unroll, activations on-chip
        # causal conv: k accumulating matmuls on shifted windows from the ref
        xpad_scratch[k - 1:, :] = x
        pre = jnp.dot(xpad_scratch[0:T, :], conv_w_ref[layer, 0],
                      preferred_element_type=f32)
        for j in range(1, k):
            pre = pre + jnp.dot(xpad_scratch[j:j + T, :], conv_w_ref[layer, j],
                                preferred_element_type=f32)
        pre = pre + conv_b_ref[layer]                                 # [T, 2H]

        # GLU along channels
        glu = pre[:, :H] * jax.nn.sigmoid(pre[:, H:])                 # [T, H]

        # ---- attention over the encoder outputs -----------------------------
        conved_emb = jnp.dot(glu, ah2e_w_ref[...],
                             preferred_element_type=f32) + ah2e_b_ref[...]   # [T, E]
        combined = (conved_emb + embedded) * SCALE                    # [T, E]
        energy = jnp.dot(combined, enc_conved_t,
                         preferred_element_type=f32) + src_mask       # [T, S_pad]
        energy = energy - jnp.max(energy, axis=-1, keepdims=True)
        p = jnp.exp(energy)
        attention = p * pl.reciprocal(jnp.sum(p, axis=-1, keepdims=True),
                                      approx=True)                    # [T, S_pad]
        attn_enc = jnp.dot(attention, enc_combined,
                           preferred_element_type=f32)                # [T, E]
        attended = jnp.dot(attn_enc, ae2h_w_ref[...],
                           preferred_element_type=f32) + ae2h_b_ref[...]     # [T, H]
        attended_combined = (glu + attended) * SCALE

        # residual with the layer's conv input
        x = (attended_combined + x) * SCALE                           # [T, H]

    # ---- folded hid2emb + fc_out (one matmul, lane-dense V_pad output) -------
    out_ref[...] = jnp.dot(x, w_out_ref[...],
                           preferred_element_type=f32) + b_out_ref[...]
    attn_ref[...] = attention


# ----------------------------- wrapper -----------------------------------------
def decoder_forward(trg, encoder_conved, encoder_combined, params, *,
                    kernel_size, trg_pad_idx):
    B, T = trg.shape
    S = encoder_conved.shape[1]
    V, E = params['tok_emb'].shape
    H = params['emb2hid_w'].shape[1]
    k = kernel_size
    n_layers = len(params['conv_w_ncl'])
    V_pad = _round_up(V, 128)
    S_pad = _round_up(S, 128)

    # ---- wrapper-side layout plumbing / exact constant folding ---------------
    # torch Conv1d weight [2H, H, k] -> [k, H, 2H] so tap-j matrix is W[:, :, j].T
    conv_w = jnp.stack([jnp.transpose(w, (2, 1, 0))
                        for w in params['conv_w_ncl']])               # [L, k, H, 2H]
    conv_b = jnp.stack([c.reshape(1, 2 * H) for c in params['conv_b']])  # [L, 1, 2H]

    # fold hid2emb + fc_out: output = x @ (Wh @ Wf) + (bh @ Wf + bf)
    hi = lax.Precision.HIGHEST
    w_out = jnp.dot(params['hid2emb_w'], params['fc_out_w'], precision=hi)   # [H, V]
    b_out = jnp.dot(params['hid2emb_b'], params['fc_out_w'],
                    precision=hi) + params['fc_out_b']                       # [V]
    w_out = jnp.zeros((H, V_pad), jnp.float32).at[:, :V].set(w_out)
    b_out = jnp.zeros((1, V_pad), jnp.float32).at[:, :V].set(b_out.reshape(1, V))

    # encoder tensors: transpose once (energy matmul needs [E, S]) + zero-pad S
    enc_conved_t = jnp.zeros((B, E, S_pad), jnp.float32).at[:, :, :S].set(
        jnp.transpose(encoder_conved, (0, 2, 1)))
    enc_combined = jnp.zeros((B, S_pad, E), jnp.float32).at[:, :S, :].set(
        encoder_combined)

    args = (
        params['pos_emb'][:T],
        params['tok_emb'],
        enc_conved_t,
        enc_combined,
        params['emb2hid_w'], params['emb2hid_b'].reshape(1, H),
        conv_w, conv_b,
        params['attn_hid2emb_w'], params['attn_hid2emb_b'].reshape(1, E),
        params['attn_emb2hid_w'], params['attn_emb2hid_b'].reshape(1, H),
        w_out, b_out,
    )

    # index_maps receive (grid idx, *prefetch refs)
    rep2 = lambda b, ids: (0, 0)
    rep3 = lambda b, ids: (0, 0, 0)
    rep4 = lambda b, ids: (0, 0, 0, 0)
    per_b3 = lambda b, ids: (b, 0, 0)

    in_specs = [
        pl.BlockSpec((T, E), rep2),                       # pos_emb
        pl.BlockSpec((V, E), rep2),                       # tok_emb
        pl.BlockSpec((None, E, S_pad), per_b3),           # enc_conved^T (per batch)
        pl.BlockSpec((None, S_pad, E), per_b3),           # enc_combined (per batch)
        pl.BlockSpec((E, H), rep2), pl.BlockSpec((1, H), rep2),
        pl.BlockSpec((n_layers, k, H, 2 * H), rep4),
        pl.BlockSpec((n_layers, 1, 2 * H), rep3),
        pl.BlockSpec((H, E), rep2), pl.BlockSpec((1, E), rep2),
        pl.BlockSpec((E, H), rep2), pl.BlockSpec((1, H), rep2),
        pl.BlockSpec((H, V_pad), rep2), pl.BlockSpec((1, V_pad), rep2),
    ]
    out_specs = [
        pl.BlockSpec((None, T, V_pad), per_b3),           # lane-dense logits slab
        pl.BlockSpec((None, T, S_pad), per_b3),           # lane-dense attention slab
    ]
    out_shapes = (jax.ShapeDtypeStruct((B, T, V_pad), jnp.float32),
                  jax.ShapeDtypeStruct((B, T, S_pad), jnp.float32))

    # advisory cost estimate
    flops = B * (2 * T * E * H
                 + n_layers * (2 * T * H * 2 * H * k + 4 * T * H * E
                               + 4 * T * S_pad * E)
                 + 2 * T * H * V_pad)
    transcendentals = B * n_layers * (T * H + T * S_pad + T)
    bytes_accessed = (sum(int(a.size) * a.dtype.itemsize for a in args)
                      + int(trg.size) * 4
                      + sum(math.prod(s.shape) * 4 for s in out_shapes))
    cost = pl.CostEstimate(flops=flops, transcendentals=transcendentals,
                           bytes_accessed=bytes_accessed)

    kern = functools.partial(decoder_kernel,
                             pad_val=float(trg_pad_idx), n_src=S)

    grid_spec = pltpu.PrefetchScalarGridSpec(
        num_scalar_prefetch=1,
        grid=(B,),
        in_specs=in_specs,
        out_specs=out_specs,
        scratch_shapes=[pltpu.VMEM((T, E), jnp.float32),
                        pltpu.VMEM((T + k - 1, H), jnp.float32)],
    )

    out_pad, attn_pad = pl.pallas_call(
        kern,
        out_shape=out_shapes,
        grid_spec=grid_spec,
        compiler_params=pltpu.CompilerParams(
            dimension_semantics=("parallel",)),
        cost_estimate=cost,
    )(trg.astype(jnp.int32), *args)

    return out_pad[:, :, :V], attn_pad[:, :, :S]


# ----------------------------- pure-JAX reference ------------------------------
def decoder_reference(trg, encoder_conved, encoder_combined, params, *,
                      kernel_size, trg_pad_idx):
    B, T = trg.shape
    tok = params['tok_emb'][trg]
    pos = params['pos_emb'][jnp.arange(T)][None]
    embedded = tok + pos                                             # [B, T, E]
    x = embedded @ params['emb2hid_w'] + params['emb2hid_b']         # [B, T, H]
    conv_input = jnp.transpose(x, (0, 2, 1))                         # [B, H, T]
    H = conv_input.shape[1]
    attention = None
    for w_ncl, b in zip(params['conv_w_ncl'], params['conv_b']):
        pad = jnp.full((B, H, kernel_size - 1), float(trg_pad_idx),
                       dtype=conv_input.dtype)
        padded = jnp.concatenate([pad, conv_input], axis=2)          # [B, H, T+k-1]
        conved = lax.conv_general_dilated(
            padded, w_ncl, window_strides=(1,), padding='VALID',
            dimension_numbers=('NCH', 'OIH', 'NCH')) + b[None, :, None]  # [B, 2H, T]
        glu = conved[:, :H, :] * jax.nn.sigmoid(conved[:, H:, :])    # [B, H, T]
        conved_emb = (jnp.transpose(glu, (0, 2, 1)) @ params['attn_hid2emb_w']
                      + params['attn_hid2emb_b'])                    # [B, T, E]
        combined = (conved_emb + embedded) * SCALE
        energy = combined @ jnp.transpose(encoder_conved, (0, 2, 1))   # [B, T, S]
        attention = jax.nn.softmax(energy, axis=-1)
        attn_enc = attention @ encoder_combined                      # [B, T, E]
        attended = attn_enc @ params['attn_emb2hid_w'] + params['attn_emb2hid_b']
        attended_combined = (glu + jnp.transpose(attended, (0, 2, 1))) * SCALE
        conv_input = (attended_combined + conv_input) * SCALE
    conved_out = (jnp.transpose(conv_input, (0, 2, 1)) @ params['hid2emb_w']
                  + params['hid2emb_b'])
    output = conved_out @ params['fc_out_w'] + params['fc_out_b']
    return output, attention


if __name__ == "__main__":
    # Module hyper-params (small, consistent with __init__)
    output_dim, emb_dim, hid_dim = 20, 32, 32
    n_layers, kernel_size, max_length = 2, 3, 50
    trg_pad_idx = 1
    B, T, S = 2, 8, 10

    keys = jax.random.split(jax.random.PRNGKey(0), 20)
    nrm = jax.random.normal
    params = {
        'tok_emb':        0.02 * nrm(keys[0], (output_dim, emb_dim), jnp.float32),
        'pos_emb':        0.02 * nrm(keys[1], (max_length, emb_dim), jnp.float32),
        'emb2hid_w':      0.05 * nrm(keys[2], (emb_dim, hid_dim), jnp.float32),
        'emb2hid_b':      0.05 * nrm(keys[3], (hid_dim,), jnp.float32),
        'hid2emb_w':      0.05 * nrm(keys[4], (hid_dim, emb_dim), jnp.float32),
        'hid2emb_b':      0.05 * nrm(keys[5], (emb_dim,), jnp.float32),
        'attn_hid2emb_w': 0.05 * nrm(keys[6], (hid_dim, emb_dim), jnp.float32),
        'attn_hid2emb_b': 0.05 * nrm(keys[7], (emb_dim,), jnp.float32),
        'attn_emb2hid_w': 0.05 * nrm(keys[8], (emb_dim, hid_dim), jnp.float32),
        'attn_emb2hid_b': 0.05 * nrm(keys[9], (hid_dim,), jnp.float32),
        'fc_out_w':       0.05 * nrm(keys[10], (emb_dim, output_dim), jnp.float32),
        'fc_out_b':       0.05 * nrm(keys[11], (output_dim,), jnp.float32),
        # PyTorch Conv1d weight layout: [out_ch=2H, in_ch=H, k]
        'conv_w_ncl': [0.05 * nrm(keys[12 + i],
                                  (2 * hid_dim, hid_dim, kernel_size),
                                  jnp.float32) for i in range(n_layers)],
        'conv_b':     [0.05 * nrm(keys[14 + i], (2 * hid_dim,), jnp.float32)
                       for i in range(n_layers)],
    }

    trg = jax.random.randint(keys[16], (B, T), 0, output_dim)
    encoder_conved = 0.1 * nrm(keys[17], (B, S, emb_dim), jnp.float32)
    encoder_combined = 0.1 * nrm(keys[18], (B, S, emb_dim), jnp.float32)

    out, attn = decoder_forward(trg, encoder_conved, encoder_combined, params,
                                kernel_size=kernel_size,
                                trg_pad_idx=trg_pad_idx)
    jax.block_until_ready((out, attn))

    r_out, r_attn = decoder_reference(trg, encoder_conved, encoder_combined,
                                      params, kernel_size=kernel_size,
                                      trg_pad_idx=trg_pad_idx)

    assert out.shape == (B, T, output_dim) and attn.shape == (B, T, S)
    # tolerances allow for TPU MXU default-precision (bf16 passes) and the
    # EUP approximate reciprocal used for the softmax denominator
    assert jnp.allclose(out, r_out, atol=2e-3, rtol=2e-2)
    assert jnp.allclose(attn, r_attn, atol=2e-3, rtol=2e-2)

    print("KERNEL_OK")
</pallas_src>

<mosaic_0001>
module attributes {stable_mosaic.version = 11 : i64} {
  func.func @decoder_kernel(%arg0: i32, %arg1: memref<2x8xi32, #tpu.memory_space<smem>>, %arg2: memref<8x32xf32, #tpu.memory_space<vmem>>, %arg3: memref<20x32xf32, #tpu.memory_space<vmem>>, %arg4: memref<1x32x128xf32, #tpu.memory_space<vmem>>, %arg5: memref<1x128x32xf32, #tpu.memory_space<vmem>>, %arg6: memref<32x32xf32, #tpu.memory_space<vmem>>, %arg7: memref<1x32xf32, #tpu.memory_space<vmem>>, %arg8: memref<2x3x32x64xf32, #tpu.memory_space<vmem>>, %arg9: memref<2x1x64xf32, #tpu.memory_space<vmem>>, %arg10: memref<32x32xf32, #tpu.memory_space<vmem>>, %arg11: memref<1x32xf32, #tpu.memory_space<vmem>>, %arg12: memref<32x32xf32, #tpu.memory_space<vmem>>, %arg13: memref<1x32xf32, #tpu.memory_space<vmem>>, %arg14: memref<32x128xf32, #tpu.memory_space<vmem>>, %arg15: memref<1x128xf32, #tpu.memory_space<vmem>>, %arg16: memref<1x8x128xf32, #tpu.memory_space<vmem>>, %arg17: memref<1x8x128xf32, #tpu.memory_space<vmem>>, %arg18: memref<8x32xf32, #tpu.memory_space<vmem>>, %arg19: memref<10x32xf32, #tpu.memory_space<vmem>>) attributes {dimension_semantics = [#tpu.dimension_semantics<parallel>], iteration_bounds = array<i64: 2>, scalar_prefetch = 1 : i64, scratch_operands = 2 : i64, tpu.core_type = #tpu.core_type<tc>, window_params = [{pipeline_mode = #tpu.pipeline_mode<synchronous>, transform_indices = @transform_0, window_bounds = array<i64: 8, 32>}, {pipeline_mode = #tpu.pipeline_mode<synchronous>, transform_indices = @transform_1, window_bounds = array<i64: 20, 32>}, {transform_indices = @transform_2, window_bounds = array<i64: 1, 32, 128>}, {transform_indices = @transform_3, window_bounds = array<i64: 1, 128, 32>}, {pipeline_mode = #tpu.pipeline_mode<synchronous>, transform_indices = @transform_4, window_bounds = array<i64: 32, 32>}, {pipeline_mode = #tpu.pipeline_mode<synchronous>, transform_indices = @transform_5, window_bounds = array<i64: 1, 32>}, {pipeline_mode = #tpu.pipeline_mode<synchronous>, transform_indices = @transform_6, window_bounds = array<i64: 2, 3, 32, 64>}, {pipeline_mode = #tpu.pipeline_mode<synchronous>, transform_indices = @transform_7, window_bounds = array<i64: 2, 1, 64>}, {pipeline_mode = #tpu.pipeline_mode<synchronous>, transform_indices = @transform_8, window_bounds = array<i64: 32, 32>}, {pipeline_mode = #tpu.pipeline_mode<synchronous>, transform_indices = @transform_9, window_bounds = array<i64: 1, 32>}, {pipeline_mode = #tpu.pipeline_mode<synchronous>, transform_indices = @transform_10, window_bounds = array<i64: 32, 32>}, {pipeline_mode = #tpu.pipeline_mode<synchronous>, transform_indices = @transform_11, window_bounds = array<i64: 1, 32>}, {pipeline_mode = #tpu.pipeline_mode<synchronous>, transform_indices = @transform_12, window_bounds = array<i64: 32, 128>}, {pipeline_mode = #tpu.pipeline_mode<synchronous>, transform_indices = @transform_13, window_bounds = array<i64: 1, 128>}, {transform_indices = @transform_14, window_bounds = array<i64: 1, 8, 128>}, {transform_indices = @transform_15, window_bounds = array<i64: 1, 8, 128>}]} {
    %0 = arith.index_cast %arg0 : i32 to index
    %c0 = arith.constant 0 : index
    %1 = memref.load %arg1[%0, %c0] : memref<2x8xi32, #tpu.memory_space<smem>>
    %2 = arith.index_cast %1 : i32 to index
    %c0_0 = arith.constant 0 : index
    %3 = vector.load %arg3[%2, %c0_0] : memref<20x32xf32, #tpu.memory_space<vmem>>, vector<1x32xf32>
    %c0_1 = arith.constant 0 : index
    %c0_2 = arith.constant 0 : index
    %4 = vector.load %arg18[%c0_1, %c0_2] : memref<8x32xf32, #tpu.memory_space<vmem>>, vector<1x32xf32>
    tpu.vector_store %arg18[%c0_1, %c0_2], %3 {strides = array<i32>} : memref<8x32xf32, #tpu.memory_space<vmem>>, vector<1x32xf32>,
    %5 = arith.index_cast %arg0 : i32 to index
    %c1 = arith.constant 1 : index
    %6 = memref.load %arg1[%5, %c1] : memref<2x8xi32, #tpu.memory_space<smem>>
    %7 = arith.index_cast %6 : i32 to index
    %c0_3 = arith.constant 0 : index
    %8 = vector.load %arg3[%7, %c0_3] : memref<20x32xf32, #tpu.memory_space<vmem>>, vector<1x32xf32>
    %c1_4 = arith.constant 1 : index
    %c0_5 = arith.constant 0 : index
    %9 = vector.load %arg18[%c1_4, %c0_5] : memref<8x32xf32, #tpu.memory_space<vmem>>, vector<1x32xf32>
    tpu.vector_store %arg18[%c1_4, %c0_5], %8 {strides = array<i32>} : memref<8x32xf32, #tpu.memory_space<vmem>>, vector<1x32xf32>,
    %10 = arith.index_cast %arg0 : i32 to index
    %c2 = arith.constant 2 : index
    %11 = memref.load %arg1[%10, %c2] : memref<2x8xi32, #tpu.memory_space<smem>>
    %12 = arith.index_cast %11 : i32 to index
    %c0_6 = arith.constant 0 : index
    %13 = vector.load %arg3[%12, %c0_6] : memref<20x32xf32, #tpu.memory_space<vmem>>, vector<1x32xf32>
    %c2_7 = arith.constant 2 : index
    %c0_8 = arith.constant 0 : index
    %14 = vector.load %arg18[%c2_7, %c0_8] : memref<8x32xf32, #tpu.memory_space<vmem>>, vector<1x32xf32>
    tpu.vector_store %arg18[%c2_7, %c0_8], %13 {strides = array<i32>} : memref<8x32xf32, #tpu.memory_space<vmem>>, vector<1x32xf32>,
    %15 = arith.index_cast %arg0 : i32 to index
    %c3 = arith.constant 3 : index
    %16 = memref.load %arg1[%15, %c3] : memref<2x8xi32, #tpu.memory_space<smem>>
    %17 = arith.index_cast %16 : i32 to index
    %c0_9 = arith.constant 0 : index
    %18 = vector.load %arg3[%17, %c0_9] : memref<20x32xf32, #tpu.memory_space<vmem>>, vector<1x32xf32>
    %c3_10 = arith.constant 3 : index
    %c0_11 = arith.constant 0 : index
    %19 = vector.load %arg18[%c3_10, %c0_11] : memref<8x32xf32, #tpu.memory_space<vmem>>, vector<1x32xf32>
    tpu.vector_store %arg18[%c3_10, %c0_11], %18 {strides = array<i32>} : memref<8x32xf32, #tpu.memory_space<vmem>>, vector<1x32xf32>,
    %20 = arith.index_cast %arg0 : i32 to index
    %c4 = arith.constant 4 : index
    %21 = memref.load %arg1[%20, %c4] : memref<2x8xi32, #tpu.memory_space<smem>>
    %22 = arith.index_cast %21 : i32 to index
    %c0_12 = arith.constant 0 : index
    %23 = vector.load %arg3[%22, %c0_12] : memref<20x32xf32, #tpu.memory_space<vmem>>, vector<1x32xf32>
    %c4_13 = arith.constant 4 : index
    %c0_14 = arith.constant 0 : index
    %24 = vector.load %arg18[%c4_13, %c0_14] : memref<8x32xf32, #tpu.memory_space<vmem>>, vector<1x32xf32>
    tpu.vector_store %arg18[%c4_13, %c0_14], %23 {strides = array<i32>} : memref<8x32xf32, #tpu.memory_space<vmem>>, vector<1x32xf32>,
    %25 = arith.index_cast %arg0 : i32 to index
    %c5 = arith.constant 5 : index
    %26 = memref.load %arg1[%25, %c5] : memref<2x8xi32, #tpu.memory_space<smem>>
    %27 = arith.index_cast %26 : i32 to index
    %c0_15 = arith.constant 0 : index
    %28 = vector.load %arg3[%27, %c0_15] : memref<20x32xf32, #tpu.memory_space<vmem>>, vector<1x32xf32>
    %c5_16 = arith.constant 5 : index
    %c0_17 = arith.constant 0 : index
    %29 = vector.load %arg18[%c5_16, %c0_17] : memref<8x32xf32, #tpu.memory_space<vmem>>, vector<1x32xf32>
    tpu.vector_store %arg18[%c5_16, %c0_17], %28 {strides = array<i32>} : memref<8x32xf32, #tpu.memory_space<vmem>>, vector<1x32xf32>,
    %30 = arith.index_cast %arg0 : i32 to index
    %c6 = arith.constant 6 : index
    %31 = memref.load %arg1[%30, %c6] : memref<2x8xi32, #tpu.memory_space<smem>>
    %32 = arith.index_cast %31 : i32 to index
    %c0_18 = arith.constant 0 : index
    %33 = vector.load %arg3[%32, %c0_18] : memref<20x32xf32, #tpu.memory_space<vmem>>, vector<1x32xf32>
    %c6_19 = arith.constant 6 : index
    %c0_20 = arith.constant 0 : index
    %34 = vector.load %arg18[%c6_19, %c0_20] : memref<8x32xf32, #tpu.memory_space<vmem>>, vector<1x32xf32>
    tpu.vector_store %arg18[%c6_19, %c0_20], %33 {strides = array<i32>} : memref<8x32xf32, #tpu.memory_space<vmem>>, vector<1x32xf32>,
    %35 = arith.index_cast %arg0 : i32 to index
    %c7 = arith.constant 7 : index
    %36 = memref.load %arg1[%35, %c7] : memref<2x8xi32, #tpu.memory_space<smem>>
    %37 = arith.index_cast %36 : i32 to index
    %c0_21 = arith.constant 0 : index
    %38 = vector.load %arg3[%37, %c0_21] : memref<20x32xf32, #tpu.memory_space<vmem>>, vector<1x32xf32>
    %c7_22 = arith.constant 7 : index
    %c0_23 = arith.constant 0 : index
    %39 = vector.load %arg18[%c7_22, %c0_23] : memref<8x32xf32, #tpu.memory_space<vmem>>, vector<1x32xf32>
    tpu.vector_store %arg18[%c7_22, %c0_23], %38 {strides = array<i32>} : memref<8x32xf32, #tpu.memory_space<vmem>>, vector<1x32xf32>,
    %c0_24 = arith.constant 0 : index
    %c0_25 = arith.constant 0 : index
    %40 = vector.load %arg18[%c0_24, %c0_25] : memref<8x32xf32, #tpu.memory_space<vmem>>, vector<8x32xf32>
    %c0_26 = arith.constant 0 : index
    %c0_27 = arith.constant 0 : index
    %41 = vector.load %arg2[%c0_26, %c0_27] : memref<8x32xf32, #tpu.memory_space<vmem>>, vector<8x32xf32>
    %42 = arith.addf %40, %41 : vector<8x32xf32>
    %c0_28 = arith.constant 0 : index
    %c0_29 = arith.constant 0 : index
    %43 = vector.load %arg6[%c0_28, %c0_29] : memref<32x32xf32, #tpu.memory_space<vmem>>, vector<32x32xf32>
    %cst = arith.constant dense<0.000000e+00> : vector<8x32xf32>
    %44 = tpu.matmul %42, %43, %cst {dimension_numbers = #tpu.dot_dimension_numbers<[1], [0], [0], [1], [0, 0, 1, 1], [], []>} : vector<8x32xf32>, vector<32x32xf32>, vector<8x32xf32> -> vector<8x32xf32>
    %c0_30 = arith.constant 0 : index
    %c0_31 = arith.constant 0 : index
    %45 = vector.load %arg7[%c0_30, %c0_31] : memref<1x32xf32, #tpu.memory_space<vmem>>, vector<1x32xf32>
    %46 = vector.broadcast %45 : vector<1x32xf32> to vector<8x32xf32>
    %47 = arith.addf %44, %46 : vector<8x32xf32>
    %c0_32 = arith.constant 0 : index
    %c0_33 = arith.constant 0 : index
    %c0_34 = arith.constant 0 : index
    %48 = vector.load %arg4[%c0_32, %c0_33, %c0_34] : memref<1x32x128xf32, #tpu.memory_space<vmem>>, vector<1x32x128xf32>
    %49 = vector.shape_cast %48 : vector<1x32x128xf32> to vector<32x128xf32>
    %c0_35 = arith.constant 0 : index
    %c0_36 = arith.constant 0 : index
    %c0_37 = arith.constant 0 : index
    %50 = vector.load %arg5[%c0_35, %c0_36, %c0_37] : memref<1x128x32xf32, #tpu.memory_space<vmem>>, vector<1x128x32xf32>
    %51 = vector.shape_cast %50 : vector<1x128x32xf32> to vector<128x32xf32>
    %cst_38 = arith.constant 1.000000e+00 : f32
    %52 = vector.broadcast %cst_38 : f32 to vector<2x32xf32>
    %c0_39 = arith.constant 0 : index
    %c0_40 = arith.constant 0 : index
    %53 = vector.load %arg19[%c0_39, %c0_40] : memref<10x32xf32, #tpu.memory_space<vmem>>, vector<2x32xf32>
    tpu.vector_store %arg19[%c0_39, %c0_40], %52 {strides = array<i32>} : memref<10x32xf32, #tpu.memory_space<vmem>>, vector<2x32xf32>,
    %54 = tpu.iota {dimensions = array<i32: 1>} : vector<8x128xi32>
    %c10_i32 = arith.constant 10 : i32
    %55 = vector.broadcast %c10_i32 : i32 to vector<8x128xi32>
    %56 = arith.cmpi slt, %54, %55 : vector<8x128xi32>
    %cst_41 = arith.constant 0.000000e+00 : f32
    %cst_42 = arith.constant -1.000000e+30 : f32
    %57 = vector.broadcast %cst_41 : f32 to vector<8x128xf32>
    %58 = vector.broadcast %cst_42 : f32 to vector<8x128xf32>
    %59 = arith.select %56, %57, %58 : vector<8x128xi1>, vector<8x128xf32>
    %c2_43 = arith.constant 2 : index
    %c0_44 = arith.constant 0 : index
    %60 = vector.load %arg19[%c2_43, %c0_44] : memref<10x32xf32, #tpu.memory_space<vmem>>, vector<8x32xf32>
    tpu.vector_store %arg19[%c2_43, %c0_44], %47 {strides = array<i32>} : memref<10x32xf32, #tpu.memory_space<vmem>>, vector<8x32xf32>,
    %c0_45 = arith.constant 0 : index
    %c0_46 = arith.constant 0 : index
    %61 = vector.load %arg19[%c0_45, %c0_46] : memref<10x32xf32, #tpu.memory_space<vmem>>, vector<8x32xf32>
    %c0_47 = arith.constant 0 : index
    %c0_48 = arith.constant 0 : index
    %c0_49 = arith.constant 0 : index
    %c0_50 = arith.constant 0 : index
    %62 = vector.load %arg8[%c0_47, %c0_48, %c0_49, %c0_50] : memref<2x3x32x64xf32, #tpu.memory_space<vmem>>, vector<1x1x32x64xf32>
    %63 = vector.shape_cast %62 : vector<1x1x32x64xf32> to vector<32x64xf32>
    %cst_51 = arith.constant dense<0.000000e+00> : vector<8x64xf32>
    %64 = tpu.matmul %61, %63, %cst_51 {dimension_numbers = #tpu.dot_dimension_numbers<[1], [0], [0], [1], [0, 0, 1, 1], [], []>} : vector<8x32xf32>, vector<32x64xf32>, vector<8x64xf32> -> vector<8x64xf32>
    %c1_52 = arith.constant 1 : index
    %c0_53 = arith.constant 0 : index
    %65 = vector.load %arg19[%c1_52, %c0_53] : memref<10x32xf32, #tpu.memory_space<vmem>>, vector<8x32xf32>
    %c0_54 = arith.constant 0 : index
    %c1_55 = arith.constant 1 : index
    %c0_56 = arith.constant 0 : index
    %c0_57 = arith.constant 0 : index
    %66 = vector.load %arg8[%c0_54, %c1_55, %c0_56, %c0_57] : memref<2x3x32x64xf32, #tpu.memory_space<vmem>>, vector<1x1x32x64xf32>
    %67 = vector.shape_cast %66 : vector<1x1x32x64xf32> to vector<32x64xf32>
    %cst_58 = arith.constant dense<0.000000e+00> : vector<8x64xf32>
    %68 = tpu.matmul %65, %67, %cst_58 {dimension_numbers = #tpu.dot_dimension_numbers<[1], [0], [0], [1], [0, 0, 1, 1], [], []>} : vector<8x32xf32>, vector<32x64xf32>, vector<8x64xf32> -> vector<8x64xf32>
    %69 = arith.addf %64, %68 : vector<8x64xf32>
    %c2_59 = arith.constant 2 : index
    %c0_60 = arith.constant 0 : index
    %70 = vector.load %arg19[%c2_59, %c0_60] : memref<10x32xf32, #tpu.memory_space<vmem>>, vector<8x32xf32>
    %c0_61 = arith.constant 0 : index
    %c2_62 = arith.constant 2 : index
    %c0_63 = arith.constant 0 : index
    %c0_64 = arith.constant 0 : index
    %71 = vector.load %arg8[%c0_61, %c2_62, %c0_63, %c0_64] : memref<2x3x32x64xf32, #tpu.memory_space<vmem>>, vector<1x1x32x64xf32>
    %72 = vector.shape_cast %71 : vector<1x1x32x64xf32> to vector<32x64xf32>
    %cst_65 = arith.constant dense<0.000000e+00> : vector<8x64xf32>
    %73 = tpu.matmul %70, %72, %cst_65 {dimension_numbers = #tpu.dot_dimension_numbers<[1], [0], [0], [1], [0, 0, 1, 1], [], []>} : vector<8x32xf32>, vector<32x64xf32>, vector<8x64xf32> -> vector<8x64xf32>
    %74 = arith.addf %69, %73 : vector<8x64xf32>
    %c0_66 = arith.constant 0 : index
    %c0_67 = arith.constant 0 : index
    %c0_68 = arith.constant 0 : index
    %75 = vector.load %arg9[%c0_66, %c0_67, %c0_68] : memref<2x1x64xf32, #tpu.memory_space<vmem>>, vector<1x1x64xf32>
    %76 = vector.shape_cast %75 : vector<1x1x64xf32> to vector<1x64xf32>
    %77 = vector.broadcast %76 : vector<1x64xf32> to vector<8x64xf32>
    %78 = arith.addf %74, %77 : vector<8x64xf32>
    %79 = vector.extract_strided_slice %78 {offsets = [0, 0], sizes = [8, 32], strides = [1, 1]} : vector<8x64xf32> to vector<8x32xf32>
    %80 = vector.extract_strided_slice %78 {offsets = [0, 32], sizes = [8, 32], strides = [1, 1]} : vector<8x64xf32> to vector<8x32xf32>
    %81 = arith.negf %80 : vector<8x32xf32>
    %82 = math.exp %81 : vector<8x32xf32>
    %cst_69 = arith.constant 1.000000e+00 : f32
    %83 = vector.broadcast %cst_69 : f32 to vector<8x32xf32>
    %84 = arith.addf %83, %82 : vector<8x32xf32>
    %85 = arith.divf %83, %84 : vector<8x32xf32>
    %86 = arith.mulf %79, %85 : vector<8x32xf32>
    %c0_70 = arith.constant 0 : index
    %c0_71 = arith.constant 0 : index
    %87 = vector.load %arg10[%c0_70, %c0_71] : memref<32x32xf32, #tpu.memory_space<vmem>>, vector<32x32xf32>
    %cst_72 = arith.constant dense<0.000000e+00> : vector<8x32xf32>
    %88 = tpu.matmul %86, %87, %cst_72 {dimension_numbers = #tpu.dot_dimension_numbers<[1], [0], [0], [1], [0, 0, 1, 1], [], []>} : vector<8x32xf32>, vector<32x32xf32>, vector<8x32xf32> -> vector<8x32xf32>
    %c0_73 = arith.constant 0 : index
    %c0_74 = arith.constant 0 : index
    %89 = vector.load %arg11[%c0_73, %c0_74] : memref<1x32xf32, #tpu.memory_space<vmem>>, vector<1x32xf32>
    %90 = vector.broadcast %89 : vector<1x32xf32> to vector<8x32xf32>
    %91 = arith.addf %88, %90 : vector<8x32xf32>
    %92 = arith.addf %91, %42 : vector<8x32xf32>
    %cst_75 = arith.constant 0.707106769 : f32
    %93 = vector.broadcast %cst_75 : f32 to vector<8x32xf32>
    %94 = arith.mulf %92, %93 : vector<8x32xf32>
    %cst_76 = arith.constant dense<0.000000e+00> : vector<8x128xf32>
    %95 = tpu.matmul %94, %49, %cst_76 {dimension_numbers = #tpu.dot_dimension_numbers<[1], [0], [0], [1], [0, 0, 1, 1], [], []>} : vector<8x32xf32>, vector<32x128xf32>, vector<8x128xf32> -> vector<8x128xf32>
    %96 = arith.addf %95, %59 : vector<8x128xf32>
    %cst_77 = arith.constant dense<0xFF800000> : vector<8xf32>
    %97 = vector.multi_reduction <maximumf>, %96, %cst_77 [1] : vector<8x128xf32> to vector<8xf32>
    %98 = vector.shape_cast %97 : vector<8xf32> to vector<8x1xf32>
    %99 = vector.broadcast %98 : vector<8x1xf32> to vector<8x128xf32>
    %100 = arith.subf %96, %99 : vector<8x128xf32>
    %101 = math.exp %100 : vector<8x128xf32>
    %cst_78 = arith.constant dense<0.000000e+00> : vector<8xf32>
    %102 = vector.multi_reduction <add>, %101, %cst_78 [1] : vector<8x128xf32> to vector<8xf32>
    %103 = vector.shape_cast %102 : vector<8xf32> to vector<8x1xf32>
    %104 = tpu.reciprocal %103 {approx = true} : vector<8x1xf32> -> vector<8x1xf32>
    %105 = vector.broadcast %104 : vector<8x1xf32> to vector<8x128xf32>
    %106 = arith.mulf %101, %105 : vector<8x128xf32>
    %cst_79 = arith.constant dense<0.000000e+00> : vector<8x32xf32>
    %107 = tpu.matmul %106, %51, %cst_79 {dimension_numbers = #tpu.dot_dimension_numbers<[1], [0], [0], [1], [0, 0, 1, 1], [], []>} : vector<8x128xf32>, vector<128x32xf32>, vector<8x32xf32> -> vector<8x32xf32>
    %c0_80 = arith.constant 0 : index
    %c0_81 = arith.constant 0 : index
    %108 = vector.load %arg12[%c0_80, %c0_81] : memref<32x32xf32, #tpu.memory_space<vmem>>, vector<32x32xf32>
    %cst_82 = arith.constant dense<0.000000e+00> : vector<8x32xf32>
    %109 = tpu.matmul %107, %108, %cst_82 {dimension_numbers = #tpu.dot_dimension_numbers<[1], [0], [0], [1], [0, 0, 1, 1], [], []>} : vector<8x32xf32>, vector<32x32xf32>, vector<8x32xf32> -> vector<8x32xf32>
    %c0_83 = arith.constant 0 : index
    %c0_84 = arith.constant 0 : index
    %110 = vector.load %arg13[%c0_83, %c0_84] : memref<1x32xf32, #tpu.memory_space<vmem>>, vector<1x32xf32>
    %111 = vector.broadcast %110 : vector<1x32xf32> to vector<8x32xf32>
    %112 = arith.addf %109, %111 : vector<8x32xf32>
    %113 = arith.addf %86, %112 : vector<8x32xf32>
    %cst_85 = arith.constant 0.707106769 : f32
    %114 = vector.broadcast %cst_85 : f32 to vector<8x32xf32>
    %115 = arith.mulf %113, %114 : vector<8x32xf32>
    %116 = arith.addf %115, %47 : vector<8x32xf32>
    %cst_86 = arith.constant 0.707106769 : f32
    %117 = vector.broadcast %cst_86 : f32 to vector<8x32xf32>
    %118 = arith.mulf %116, %117 : vector<8x32xf32>
    %c2_87 = arith.constant 2 : index
    %c0_88 = arith.constant 0 : index
    %119 = vector.load %arg19[%c2_87, %c0_88] : memref<10x32xf32, #tpu.memory_space<vmem>>, vector<8x32xf32>
    tpu.vector_store %arg19[%c2_87, %c0_88], %118 {strides = array<i32>} : memref<10x32xf32, #tpu.memory_space<vmem>>, vector<8x32xf32>,
    %c0_89 = arith.constant 0 : index
    %c0_90 = arith.constant 0 : index
    %120 = vector.load %arg19[%c0_89, %c0_90] : memref<10x32xf32, #tpu.memory_space<vmem>>, vector<8x32xf32>
    %c1_91 = arith.constant 1 : index
    %c0_92 = arith.constant 0 : index
    %c0_93 = arith.constant 0 : index
    %c0_94 = arith.constant 0 : index
    %121 = vector.load %arg8[%c1_91, %c0_92, %c0_93, %c0_94] : memref<2x3x32x64xf32, #tpu.memory_space<vmem>>, vector<1x1x32x64xf32>
    %122 = vector.shape_cast %121 : vector<1x1x32x64xf32> to vector<32x64xf32>
    %cst_95 = arith.constant dense<0.000000e+00> : vector<8x64xf32>
    %123 = tpu.matmul %120, %122, %cst_95 {dimension_numbers = #tpu.dot_dimension_numbers<[1], [0], [0], [1], [0, 0, 1, 1], [], []>} : vector<8x32xf32>, vector<32x64xf32>, vector<8x64xf32> -> vector<8x64xf32>
    %c1_96 = arith.constant 1 : index
    %c0_97 = arith.constant 0 : index
    %124 = vector.load %arg19[%c1_96, %c0_97] : memref<10x32xf32, #tpu.memory_space<vmem>>, vector<8x32xf32>
    %c1_98 = arith.constant 1 : index
    %c1_99 = arith.constant 1 : index
    %c0_100 = arith.constant 0 : index
    %c0_101 = arith.constant 0 : index
    %125 = vector.load %arg8[%c1_98, %c1_99, %c0_100, %c0_101] : memref<2x3x32x64xf32, #tpu.memory_space<vmem>>, vector<1x1x32x64xf32>
    %126 = vector.shape_cast %125 : vector<1x1x32x64xf32> to vector<32x64xf32>
    %cst_102 = arith.constant dense<0.000000e+00> : vector<8x64xf32>
    %127 = tpu.matmul %124, %126, %cst_102 {dimension_numbers = #tpu.dot_dimension_numbers<[1], [0], [0], [1], [0, 0, 1, 1], [], []>} : vector<8x32xf32>, vector<32x64xf32>, vector<8x64xf32> -> vector<8x64xf32>
    %128 = arith.addf %123, %127 : vector<8x64xf32>
    %c2_103 = arith.constant 2 : index
    %c0_104 = arith.constant 0 : index
    %129 = vector.load %arg19[%c2_103, %c0_104] : memref<10x32xf32, #tpu.memory_space<vmem>>, vector<8x32xf32>
    %c1_105 = arith.constant 1 : index
    %c2_106 = arith.constant 2 : index
    %c0_107 = arith.constant 0 : index
    %c0_108 = arith.constant 0 : index
    %130 = vector.load %arg8[%c1_105, %c2_106, %c0_107, %c0_108] : memref<2x3x32x64xf32, #tpu.memory_space<vmem>>, vector<1x1x32x64xf32>
    %131 = vector.shape_cast %130 : vector<1x1x32x64xf32> to vector<32x64xf32>
    %cst_109 = arith.constant dense<0.000000e+00> : vector<8x64xf32>
    %132 = tpu.matmul %129, %131, %cst_109 {dimension_numbers = #tpu.dot_dimension_numbers<[1], [0], [0], [1], [0, 0, 1, 1], [], []>} : vector<8x32xf32>, vector<32x64xf32>, vector<8x64xf32> -> vector<8x64xf32>
    %133 = arith.addf %128, %132 : vector<8x64xf32>
    %c1_110 = arith.constant 1 : index
    %c0_111 = arith.constant 0 : index
    %c0_112 = arith.constant 0 : index
    %134 = vector.load %arg9[%c1_110, %c0_111, %c0_112] : memref<2x1x64xf32, #tpu.memory_space<vmem>>, vector<1x1x64xf32>
    %135 = vector.shape_cast %134 : vector<1x1x64xf32> to vector<1x64xf32>
    %136 = vector.broadcast %135 : vector<1x64xf32> to vector<8x64xf32>
    %137 = arith.addf %133, %136 : vector<8x64xf32>
    %138 = vector.extract_strided_slice %137 {offsets = [0, 0], sizes = [8, 32], strides = [1, 1]} : vector<8x64xf32> to vector<8x32xf32>
    %139 = vector.extract_strided_slice %137 {offsets = [0, 32], sizes = [8, 32], strides = [1, 1]} : vector<8x64xf32> to vector<8x32xf32>
    %140 = arith.negf %139 : vector<8x32xf32>
    %141 = math.exp %140 : vector<8x32xf32>
    %cst_113 = arith.constant 1.000000e+00 : f32
    %142 = vector.broadcast %cst_113 : f32 to vector<8x32xf32>
    %143 = arith.addf %142, %141 : vector<8x32xf32>
    %144 = arith.divf %142, %143 : vector<8x32xf32>
    %145 = arith.mulf %138, %144 : vector<8x32xf32>
    %c0_114 = arith.constant 0 : index
    %c0_115 = arith.constant 0 : index
    %146 = vector.load %arg10[%c0_114, %c0_115] : memref<32x32xf32, #tpu.memory_space<vmem>>, vector<32x32xf32>
    %cst_116 = arith.constant dense<0.000000e+00> : vector<8x32xf32>
    %147 = tpu.matmul %145, %146, %cst_116 {dimension_numbers = #tpu.dot_dimension_numbers<[1], [0], [0], [1], [0, 0, 1, 1], [], []>} : vector<8x32xf32>, vector<32x32xf32>, vector<8x32xf32> -> vector<8x32xf32>
    %c0_117 = arith.constant 0 : index
    %c0_118 = arith.constant 0 : index
    %148 = vector.load %arg11[%c0_117, %c0_118] : memref<1x32xf32, #tpu.memory_space<vmem>>, vector<1x32xf32>
    %149 = vector.broadcast %148 : vector<1x32xf32> to vector<8x32xf32>
    %150 = arith.addf %147, %149 : vector<8x32xf32>
    %151 = arith.addf %150, %42 : vector<8x32xf32>
    %cst_119 = arith.constant 0.707106769 : f32
    %152 = vector.broadcast %cst_119 : f32 to vector<8x32xf32>
    %153 = arith.mulf %151, %152 : vector<8x32xf32>
    %cst_120 = arith.constant dense<0.000000e+00> : vector<8x128xf32>
    %154 = tpu.matmul %153, %49, %cst_120 {dimension_numbers = #tpu.dot_dimension_numbers<[1], [0], [0], [1], [0, 0, 1, 1], [], []>} : vector<8x32xf32>, vector<32x128xf32>, vector<8x128xf32> -> vector<8x128xf32>
    %155 = arith.addf %154, %59 : vector<8x128xf32>
    %cst_121 = arith.constant dense<0xFF800000> : vector<8xf32>
    %156 = vector.multi_reduction <maximumf>, %155, %cst_121 [1] : vector<8x128xf32> to vector<8xf32>
    %157 = vector.shape_cast %156 : vector<8xf32> to vector<8x1xf32>
    %158 = vector.broadcast %157 : vector<8x1xf32> to vector<8x128xf32>
    %159 = arith.subf %155, %158 : vector<8x128xf32>
    %160 = math.exp %159 : vector<8x128xf32>
    %cst_122 = arith.constant dense<0.000000e+00> : vector<8xf32>
    %161 = vector.multi_reduction <add>, %160, %cst_122 [1] : vector<8x128xf32> to vector<8xf32>
    %162 = vector.shape_cast %161 : vector<8xf32> to vector<8x1xf32>
    %163 = tpu.reciprocal %162 {approx = true} : vector<8x1xf32> -> vector<8x1xf32>
    %164 = vector.broadcast %163 : vector<8x1xf32> to vector<8x128xf32>
    %165 = arith.mulf %160, %164 : vector<8x128xf32>
    %cst_123 = arith.constant dense<0.000000e+00> : vector<8x32xf32>
    %166 = tpu.matmul %165, %51, %cst_123 {dimension_numbers = #tpu.dot_dimension_numbers<[1], [0], [0], [1], [0, 0, 1, 1], [], []>} : vector<8x128xf32>, vector<128x32xf32>, vector<8x32xf32> -> vector<8x32xf32>
    %c0_124 = arith.constant 0 : index
    %c0_125 = arith.constant 0 : index
    %167 = vector.load %arg12[%c0_124, %c0_125] : memref<32x32xf32, #tpu.memory_space<vmem>>, vector<32x32xf32>
    %cst_126 = arith.constant dense<0.000000e+00> : vector<8x32xf32>
    %168 = tpu.matmul %166, %167, %cst_126 {dimension_numbers = #tpu.dot_dimension_numbers<[1], [0], [0], [1], [0, 0, 1, 1], [], []>} : vector<8x32xf32>, vector<32x32xf32>, vector<8x32xf32> -> vector<8x32xf32>
    %c0_127 = arith.constant 0 : index
    %c0_128 = arith.constant 0 : index
    %169 = vector.load %arg13[%c0_127, %c0_128] : memref<1x32xf32, #tpu.memory_space<vmem>>, vector<1x32xf32>
    %170 = vector.broadcast %169 : vector<1x32xf32> to vector<8x32xf32>
    %171 = arith.addf %168, %170 : vector<8x32xf32>
    %172 = arith.addf %145, %171 : vector<8x32xf32>
    %cst_129 = arith.constant 0.707106769 : f32
    %173 = vector.broadcast %cst_129 : f32 to vector<8x32xf32>
    %174 = arith.mulf %172, %173 : vector<8x32xf32>
    %175 = arith.addf %174, %118 : vector<8x32xf32>
    %cst_130 = arith.constant 0.707106769 : f32
    %176 = vector.broadcast %cst_130 : f32 to vector<8x32xf32>
    %177 = arith.mulf %175, %176 : vector<8x32xf32>
    %c0_131 = arith.constant 0 : index
    %c0_132 = arith.constant 0 : index
    %178 = vector.load %arg14[%c0_131, %c0_132] : memref<32x128xf32, #tpu.memory_space<vmem>>, vector<32x128xf32>
    %cst_133 = arith.constant dense<0.000000e+00> : vector<8x128xf32>
    %179 = tpu.matmul %177, %178, %cst_133 {dimension_numbers = #tpu.dot_dimension_numbers<[1], [0], [0], [1], [0, 0, 1, 1], [], []>} : vector<8x32xf32>, vector<32x128xf32>, vector<8x128xf32> -> vector<8x128xf32>
    %c0_134 = arith.constant 0 : index
    %c0_135 = arith.constant 0 : index
    %180 = vector.load %arg15[%c0_134, %c0_135] : memref<1x128xf32, #tpu.memory_space<vmem>>, vector<1x128xf32>
    %181 = vector.broadcast %180 : vector<1x128xf32> to vector<8x128xf32>
    %182 = arith.addf %179, %181 : vector<8x128xf32>
    %c0_136 = arith.constant 0 : index
    %c0_137 = arith.constant 0 : index
    %c0_138 = arith.constant 0 : index
    %183 = vector.load %arg16[%c0_136, %c0_137, %c0_138] : memref<1x8x128xf32, #tpu.memory_space<vmem>>, vector<1x8x128xf32>
    %184 = vector.shape_cast %183 : vector<1x8x128xf32> to vector<8x128xf32>
    %185 = vector.shape_cast %182 : vector<8x128xf32> to vector<1x8x128xf32>
    tpu.vector_store %arg16[%c0_136, %c0_137, %c0_138], %185 {strides = array<i32>} : memref<1x8x128xf32, #tpu.memory_space<vmem>>, vector<1x8x128xf32>,
    %c0_139 = arith.constant 0 : index
    %c0_140 = arith.constant 0 : index
    %c0_141 = arith.constant 0 : index
    %186 = vector.load %arg17[%c0_139, %c0_140, %c0_141] : memref<1x8x128xf32, #tpu.memory_space<vmem>>, vector<1x8x128xf32>
    %187 = vector.shape_cast %186 : vector<1x8x128xf32> to vector<8x128xf32>
    %188 = vector.shape_cast %165 : vector<8x128xf32> to vector<1x8x128xf32>
    tpu.vector_store %arg17[%c0_139, %c0_140, %c0_141], %188 {strides = array<i32>} : memref<1x8x128xf32, #tpu.memory_space<vmem>>, vector<1x8x128xf32>,
    return
  }
  func.func @transform_0(%arg0: i32, %arg1: memref<2x8xi32, #tpu.memory_space<smem>>) -> (i32, i32) {
    %c0_i32 = arith.constant 0 : i32
    %c0_i32_0 = arith.constant 0 : i32
    %c0_i32_1 = arith.constant 0 : i32
    return %c0_i32, %c0_i32_0 : i32, i32
  }
  func.func @transform_1(%arg0: i32, %arg1: memref<2x8xi32, #tpu.memory_space<smem>>) -> (i32, i32) {
    %c0_i32 = arith.constant 0 : i32
    %c0_i32_0 = arith.constant 0 : i32
    %c0_i32_1 = arith.constant 0 : i32
    return %c0_i32, %c0_i32_0 : i32, i32
  }
  func.func @transform_2(%arg0: i32, %arg1: memref<2x8xi32, #tpu.memory_space<smem>>) -> (i32, i32, i32) {
    %c0_i32 = arith.constant 0 : i32
    %c0_i32_0 = arith.constant 0 : i32
    %c0_i32_1 = arith.constant 0 : i32
    return %arg0, %c0_i32, %c0_i32_0 : i32, i32, i32
  }
  func.func @transform_3(%arg0: i32, %arg1: memref<2x8xi32, #tpu.memory_space<smem>>) -> (i32, i32, i32) {
    %c0_i32 = arith.constant 0 : i32
    %c0_i32_0 = arith.constant 0 : i32
    %c0_i32_1 = arith.constant 0 : i32
    return %arg0, %c0_i32, %c0_i32_0 : i32, i32, i32
  }
  func.func @transform_4(%arg0: i32, %arg1: memref<2x8xi32, #tpu.memory_space<smem>>) -> (i32, i32) {
    %c0_i32 = arith.constant 0 : i32
    %c0_i32_0 = arith.constant 0 : i32
    %c0_i32_1 = arith.constant 0 : i32
    return %c0_i32, %c0_i32_0 : i32, i32
  }
  func.func @transform_5(%arg0: i32, %arg1: memref<2x8xi32, #tpu.memory_space<smem>>) -> (i32, i32) {
    %c0_i32 = arith.constant 0 : i32
    %c0_i32_0 = arith.constant 0 : i32
    %c0_i32_1 = arith.constant 0 : i32
    return %c0_i32, %c0_i32_0 : i32, i32
  }
  func.func @transform_6(%arg0: i32, %arg1: memref<2x8xi32, #tpu.memory_space<smem>>) -> (i32, i32, i32, i32) {
    %c0_i32 = arith.constant 0 : i32
    %c0_i32_0 = arith.constant 0 : i32
    %c0_i32_1 = arith.constant 0 : i32
    %c0_i32_2 = arith.constant 0 : i32
    %c0_i32_3 = arith.constant 0 : i32
    return %c0_i32, %c0_i32_0, %c0_i32_1, %c0_i32_2 : i32, i32, i32, i32
  }
  func.func @transform_7(%arg0: i32, %arg1: memref<2x8xi32, #tpu.memory_space<smem>>) -> (i32, i32, i32) {
    %c0_i32 = arith.constant 0 : i32
    %c0_i32_0 = arith.constant 0 : i32
    %c0_i32_1 = arith.constant 0 : i32
    %c0_i32_2 = arith.constant 0 : i32
    return %c0_i32, %c0_i32_0, %c0_i32_1 : i32, i32, i32
  }
  func.func @transform_8(%arg0: i32, %arg1: memref<2x8xi32, #tpu.memory_space<smem>>) -> (i32, i32) {
    %c0_i32 = arith.constant 0 : i32
    %c0_i32_0 = arith.constant 0 : i32
    %c0_i32_1 = arith.constant 0 : i32
    return %c0_i32, %c0_i32_0 : i32, i32
  }
  func.func @transform_9(%arg0: i32, %arg1: memref<2x8xi32, #tpu.memory_space<smem>>) -> (i32, i32) {
    %c0_i32 = arith.constant 0 : i32
    %c0_i32_0 = arith.constant 0 : i32
    %c0_i32_1 = arith.constant 0 : i32
    return %c0_i32, %c0_i32_0 : i32, i32
  }
  func.func @transform_10(%arg0: i32, %arg1: memref<2x8xi32, #tpu.memory_space<smem>>) -> (i32, i32) {
    %c0_i32 = arith.constant 0 : i32
    %c0_i32_0 = arith.constant 0 : i32
    %c0_i32_1 = arith.constant 0 : i32
    return %c0_i32, %c0_i32_0 : i32, i32
  }
  func.func @transform_11(%arg0: i32, %arg1: memref<2x8xi32, #tpu.memory_space<smem>>) -> (i32, i32) {
    %c0_i32 = arith.constant 0 : i32
    %c0_i32_0 = arith.constant 0 : i32
    %c0_i32_1 = arith.constant 0 : i32
    return %c0_i32, %c0_i32_0 : i32, i32
  }
  func.func @transform_12(%arg0: i32, %arg1: memref<2x8xi32, #tpu.memory_space<smem>>) -> (i32, i32) {
    %c0_i32 = arith.constant 0 : i32
    %c0_i32_0 = arith.constant 0 : i32
    %c0_i32_1 = arith.constant 0 : i32
    return %c0_i32, %c0_i32_0 : i32, i32
  }
  func.func @transform_13(%arg0: i32, %arg1: memref<2x8xi32, #tpu.memory_space<smem>>) -> (i32, i32) {
    %c0_i32 = arith.constant 0 : i32
    %c0_i32_0 = arith.constant 0 : i32
    %c0_i32_1 = arith.constant 0 : i32
    return %c0_i32, %c0_i32_0 : i32, i32
  }
  func.func @transform_14(%arg0: i32, %arg1: memref<2x8xi32, #tpu.memory_space<smem>>) -> (i32, i32, i32) {
    %c0_i32 = arith.constant 0 : i32
    %c0_i32_0 = arith.constant 0 : i32
    %c0_i32_1 = arith.constant 0 : i32
    return %arg0, %c0_i32, %c0_i32_0 : i32, i32, i32
  }
  func.func @transform_15(%arg0: i32, %arg1: memref<2x8xi32, #tpu.memory_space<smem>>) -> (i32, i32, i32) {
    %c0_i32 = arith.constant 0 : i32
    %c0_i32_0 = arith.constant 0 : i32
    %c0_i32_1 = arith.constant 0 : i32
    return %arg0, %c0_i32, %c0_i32_0 : i32, i32, i32
  }
}

</mosaic_0001>

<bundles_post_ra>
// kernel: tpu_custom_call.1
= control target key start
LH: loop header
LB: loop body
LE: loop exit
PB: predicated region body
PF: predicated region fallthrough
CT: control target
= control target key end

     0   :  { %s3851_s0 = inlined_call_operand.vmem [shape: s32[2,8], index: 0, kind: input, shape index: {}]   ;;  %s3852_s1 = inlined_call_operand.hbm [shape: f32[8,32], index: 1, kind: input, shape index: {}]   ;;  %s3853_s2 = inlined_call_operand.hbm [shape: f32[20,32], index: 2, kind: input, shape index: {}]   ;;  %s3854_s3 = inlined_call_operand.vmem [shape: f32[2,32,128], index: 3, kind: input, shape index: {}]   ;;  %s3855_s4 = inlined_call_operand.vmem [shape: f32[2,128,32], index: 4, kind: input, shape index: {}]   ;;  %s3856_s5 = inlined_call_operand.vmem [shape: f32[32,32], index: 5, kind: input, shape index: {}]   ;;  %s3857_s6 = inlined_call_operand.hbm [shape: f32[1,32], index: 6, kind: input, shape index: {}]   ;;  %s3858_s7 = inlined_call_operand.vmem [shape: f32[2,3,32,64], index: 7, kind: input, shape index: {}]   ;;  %s3859_s8 = inlined_call_operand.hbm [shape: f32[2,1,64], index: 8, kind: input, shape index: {}]   ;;  %s3860_s9 = inlined_call_operand.vmem [shape: f32[32,32], index: 9, kind: input, shape index: {}]   ;;  %s3861_s10 = inlined_call_operand.vmem [shape: f32[1,32], index: 10, kind: input, shape index: {}]   ;;  %s3862_s11 = inlined_call_operand.vmem [shape: f32[32,32], index: 11, kind: input, shape index: {}]   ;;  %s3863_s12 = inlined_call_operand.vmem [shape: f32[1,32], index: 12, kind: input, shape index: {}]   ;;  %s3864_s13 = inlined_call_operand.hbm [shape: f32[32,128], index: 13, kind: input, shape index: {}]   ;;  %s3865_s14 = inlined_call_operand.vmem [shape: f32[1,128], index: 14, kind: input, shape index: {}]   ;;  %s3866_s15 = inlined_call_operand.hbm [shape: f32[2,8,128], index: 15, kind: output, shape index: {0}]   ;;  %s3867_s16 = inlined_call_operand.hbm [shape: f32[2,8,128], index: 16, kind: output, shape index: {1}]  }
   0x1   :  { %3881 = sst [smem:[#allocation30_spill]] %s3851_s0 }
   0x2   :  { %3882 = sst [smem:[#allocation31_spill]] %s3852_s1  ;;  %s3889_s23 = sld [smem:[#allocation30_spill]] }
   0x3   :  { %3883 = sst [smem:[#allocation32_spill]] %s3853_s2 }
   0x4   :  { %3884 = sst [smem:[#allocation33_spill]] %s3855_s4 }
   0x5   :  { %3885 = sst [smem:[#allocation34_spill]] %s3857_s6 }
   0x6   :  { %3886 = sst [smem:[#allocation35_spill]] %s3865_s14 }
   0x7   :  { %3887 = sst [smem:[#allocation36_spill]] %s3866_s15 }
   0x8   :  { %3888 = sst [smem:[#allocation37_spill]] %s3867_s16  ;;  %s22_s4 = sshll.u32 %s3889_s23, 4  ;;  %s23_s4 = int_to_ptr.vmem [resolvable:$true] %s22_s4 }
   0x9   :  { %s2857_s24 = scalar_lea.vmem %s23_s4, 32  ;;  %p2862_p1 = scmp.lt.s32.totalorder %s23_s4, %s23_s4 }
   0xa   :  { %p2858_p0 = scmp.ne.s32.totalorder %s23_s4, %s2857_s24  ;;  %p2863_p2 = scmp.lt.s32.totalorder %s2857_s24, %s2857_s24 }
   0xc   :  { %p2864_p3 = por %p2863_p2, %p2862_p1 }
   0xe   :  { %p2865_p4 = pnand %p2864_p3, %p2858_p0 }
  0x10   :  { %2868 = shalt.err (!%p2865_p4)  }
  0x11   :  { %s3119_s25 = smov [#allocation5]  }
  0x12   :  { %25 = dma.vmem_to_smem %s23_s4, 32, %s3119_s25, [#allocation4] }
  0x13   :  { %3081 = dma.done.wait [#allocation4], 32 }
  0x14   :  { %3082 = vsyncadd [#allocation4], 4294967264 }
  0x15   :  { %27 = sfence }
  0x16   :  { %28 = vsyncpa [#allocation7], 0 }
  0x17   :  { %29 = vsyncpa [#allocation10], 0 }
  0x18   :  { %30 = vsyncpa [#allocation13], 0 }
  0x19   :  { %31 = vsyncpa [#allocation8], 0 }
  0x1a   :  { %33 = vsyncpa [#allocation8 + $0x1], 0 }
  0x1b   :  { %34 = vsyncpa [#allocation17], 0 }
  0x1c   :  { %36 = vsyncpa [#allocation17 + $0x1], 0  ;;  %s3225_s26 = smov 0   ;;  %s3227_s27 = smov 0  }
  0x1d   :  { %s3229_s28 = smov 0   ;;  %s3231_s29 = smov 0  }
  0x1e LB: > { %3890 = sst [smem:[#allocation24_spill]] %s3105_s26  ;;  %s3246_s4 = sadd.s32 4294967295, %s3117_s29   ;;  %s3117_s29 = sphi %s3231_s29, %s3923_s29   ;;  %s3113_s28 = sphi %s3229_s28, %s3925_s28   ;;  %s3109_s27 = sphi %s3227_s27, %s3927_s27   ;;  %s3105_s26 = sphi %s3225_s26, %s3926_s26  }
  0x1f   : > { %3891 = sst [smem:[#allocation25_spill]] %s3113_s28  ;;  %s2202_s30 = sadd.s32 4294967294, %s3117_s29  }
  0x20   : > { %3892 = sst [smem:[#allocation26_spill]] %s3117_s29  ;;  %s3250_s0 = sadd.s32 1, %s3117_s29  }
  0x21   : > { %3893 = sst [smem:[#allocation27_spill]] %s3250_s0  ;;  %s353_s17 = sadd.s32 1, %s3113_s28 }
  0x22   : > { %s350_s18 = ssub.s32 %s3117_s29, %s3250_s0  ;;  %p363_p5 = scmp.ne.s32.totalorder %s3113_s28, %s3109_s27 }
  0x23   : > { %p351_p6 = scmp.eq.s32.totalorder %s350_s18, 0  ;;  %p364_p7 = scmp.eq.s32.totalorder %s3246_s4, 1 }
  0x24   : > { %p369_p8 = scmp.ne.s32.totalorder %s3109_s27, %s3105_s26  ;;  %p370_p9 = scmp.eq.s32.totalorder %s2202_s30, 1 }
  0x25   : > { %s3261_s19 = scalar_select %p351_p6, %s3113_s28, %s353_s17  }
  0x26   : > { %p3263_p10 = por %p364_p7, %p363_p5  ;;  %p3267_p11 = por %p370_p9, %p369_p8 }
  0x27   : > { %3894 = sst [smem:[#allocation28_spill]] %s3261_s19  ;;  %p2203_p12 = scmp.ge.s32.totalorder %s3117_s29, 1 }
  0x28   : > { %s3895_s20 = scalar_select %p3263_p10, 1, 0 }
  0x29   : > { %s3896_s21 = scalar_select %p3267_p11, 1, 0 }
  0x2a   : > { %p403_p13 = scmp.lt.s32.totalorder %s3117_s29, 3  ;;  %p3873_p0 = scmp.eq.s32.totalorder %s3246_s4, 0 }
  0x2b   : > { %3897 = sst [smem:[#allocation29_spill]] %s3896_s21  ;;  %s3120_s23 = smov [#allocation9]  }
  0x2c   : > { %p3274_p1 = pnand %p2203_p12, %p403_p13  ;;  %s426_s24 = sshll.u32 %s3120_s23, 4  ;;  %s427_s24 = int_to_ptr.vmem [resolvable:$true] %s426_s24 }
  0x2d   : > { %s3121_s30 = smov [#allocation12]   ;;  %s3900_s2 = sld [smem:[#allocation32_spill]] }
  0x2e   : > { %s3898_s22 = scalar_select %p3274_p1, 1, 0 }
  0x2f   : > { %p2759_p2 = pneg %p3274_p1  ;;  %s456_s17 = sshll.u32 %s3121_s30, 4  ;;  %s3286_s17 = int_to_ptr.vmem [resolvable:$true] %s456_s17 }
  0x31   : > { %p3282_p3 = pnand %p3873_p0, %p2759_p2 }
  0x33   : > { %s2869_s28 = scalar_lea.hbm %s3900_s2, 384  ;;  %p3296_p5 = pneg %p3282_p3 }
  0x34   : > { %p2870_p4 = scmp.ne.s32.totalorder %s3900_s2, %s2869_s28  ;;  %p2876_p8 = scmp.lt.u32.totalorder %s2869_s28, %s3900_s2 }
  0x36   : > { %p2872_p6 = pnand %p3296_p5, %p2870_p4 }
  0x38   : > { %p2873_p7 = pneg %p2872_p6 }
  0x3a   : > { %p2878_p9 = pnand %p2876_p8, %p2873_p7 }
  0x3c   : > { %2881 = shalt.err (!%p2878_p9)
}
  0x3d   : > { %s2882_s19 = scalar_lea.vmem %s427_s24, 384  ;;  %p2890_p0 = scmp.lt.s32.totalorder %s427_s24, %s427_s24 }
  0x3e   : > { %p2883_p12 = scmp.ne.s32.totalorder %s427_s24, %s2882_s19  ;;  %p2891_p11 = scmp.lt.s32.totalorder %s2882_s19, %s2882_s19 }
  0x40   : > { %p2885_p13 = pnand %p2883_p12, %p3296_p5  ;;  %p2892_p10 = por %p2891_p11, %p2890_p0 }
  0x42   : > { %p2886_p2 = pneg %p2885_p13 }
  0x44   : > { %p2893_p1 = pnand %p2892_p10, %p2886_p2 }
  0x46   : > { %2896 = shalt.err (!%p2893_p1)
}
  0x47   : > { %s3879_s0 = smov 128   ;;  %s3880_s21 = smov 8  }
  0x48   : > { %2765 = dma.hbm_to_vmem [thread:$0]  (!%p3282_p3), %s3900_s2, 384, %s427_s24, [#allocation10], %s3879_s0, %s3879_s0, %s3880_s21  }
  0x49   : > { %s2897_s29 = scalar_lea.hbm %s3859_s8, 32 }
  0x4a   : > { %p2898_p10 = scmp.ne.s32.totalorder %s3859_s8, %s2897_s29  ;;  %p2904_p1 = scmp.lt.u32.totalorder %s2897_s29, %s3859_s8 }
  0x4c   : > { %p2900_p11 = pnand %p2898_p10, %p3296_p5 }
  0x4e   : > { %p2901_p0 = pneg %p2900_p11 }
  0x50   : > { %p2906_p4 = pnand %p2904_p1, %p2901_p0 }
  0x52   : > { %2909 = shalt.err (!%p2906_p4)
}
  0x53   : > { %s2910_s24 = scalar_lea.vmem %s3286_s17, 32  ;;  %p2918_p9 = scmp.lt.s32.totalorder %s3286_s17, %s3286_s17 }
  0x54   : > { %p2911_p6 = scmp.ne.s32.totalorder %s3286_s17, %s2910_s24  ;;  %p2919_p12 = scmp.lt.s32.totalorder %s2910_s24, %s2910_s24 }
  0x56   : > { %p2913_p7 = pnand %p2911_p6, %p3296_p5  ;;  %p2920_p13 = por %p2919_p12, %p2918_p9 }
  0x58   : > { %p2914_p8 = pneg %p2913_p7 }
  0x5a   : > { %p2921_p2 = pnand %p2920_p13, %p2914_p8 }
  0x5c   : > { %2924 = shalt.err (!%p2921_p2)
}
  0x5d   : > { %s3124_s15 = smov 16   ;;  %s3125_s14 = smov 1  }
  0x5e   : > { %2771 = dma.hbm_to_vmem [thread:$0]  (!%p3282_p3), %s3859_s8, 32, %s3286_s17, [#allocation13], %s3124_s15, %s3124_s15, %s3125_s14  }
  0x5f   : > { %s3126_s26 = smov [#allocation6]   ;;  %s3127_s18 = smov [#allocation11]  }
  0x60   : > { %s416_s28 = sshll.u32 %s3126_s26, 4  ;;  %s443_s30 = sshll.u32 %s3127_s18, 4  ;;  %s417_s28 = int_to_ptr.vmem [resolvable:$true] %s416_s28  ;;  %s3338_s30 = int_to_ptr.vmem [resolvable:$true] %s443_s30 }
  0x61   : > { %s3902_s1 = sld [smem:[#allocation31_spill]] }
  0x67   : > { %s2925_s0 = scalar_lea.hbm %s3902_s1, 128 }
  0x68   : > { %p2926_p10 = scmp.ne.s32.totalorder %s3902_s1, %s2925_s0  ;;  %p2932_p1 = scmp.lt.u32.totalorder %s2925_s0, %s3902_s1 }
  0x6a   : > { %p2928_p11 = pnand %p2926_p10, %p3296_p5 }
  0x6c   : > { %p2929_p0 = pneg %p2928_p11 }
  0x6e   : > { %p2934_p4 = pnand %p2932_p1, %p2929_p0 }
  0x70   : > { %2937 = shalt.err (!%p2934_p4)
}
  0x71   : > { %s2938_s15 = scalar_lea.vmem %s417_s28, 128  ;;  %p2946_p9 = scmp.lt.s32.totalorder %s417_s28, %s417_s28 }
  0x72   : > { %p2939_p6 = scmp.ne.s32.totalorder %s417_s28, %s2938_s15  ;;  %p2947_p12 = scmp.lt.s32.totalorder %s2938_s15, %s2938_s15 }
  0x74   : > { %p2941_p7 = pnand %p2939_p6, %p3296_p5  ;;  %p2948_p13 = por %p2947_p12, %p2946_p9 }
  0x76   : > { %p2942_p8 = pneg %p2941_p7 }
  0x78   : > { %p2949_p2 = pnand %p2948_p13, %p2942_p8 }
  0x7a   : > { %2952 = shalt.err (!%p2949_p2)
}
  0x7b   : > { %2762 = dma.hbm_to_vmem [thread:$0]  (!%p3282_p3), %s3902_s1, 128, %s417_s28, [#allocation7]  }
  0x7c   : > { %s3903_s6 = sld [smem:[#allocation34_spill]] }
  0x82   : > { %s2953_s29 = scalar_lea.hbm %s3903_s6, 16 }
  0x83   : > { %p2954_p10 = scmp.ne.s32.totalorder %s3903_s6, %s2953_s29  ;;  %p2960_p1 = scmp.lt.u32.totalorder %s2953_s29, %s3903_s6 }
  0x85   : > { %p2956_p11 = pnand %p2954_p10, %p3296_p5 }
  0x87   : > { %p2957_p0 = pneg %p2956_p11 }
  0x89   : > { %p2962_p4 = pnand %p2960_p1, %p2957_p0 }
  0x8b   : > { %2965 = shalt.err (!%p2962_p4)
}
  0x8c   : > { %s2966_s28 = scalar_lea.vmem %s3338_s30, 16  ;;  %s2973_s16 = scalar_lea.vmem %s3338_s30, 32 }
  0x8d   : > { %p2967_p6 = scmp.ne.s32.totalorder %s3338_s30, %s2966_s28  ;;  %p2974_p9 = scmp.lt.s32.totalorder %s3338_s30, %s3338_s30 }
  0x8e   : > { %p2975_p12 = scmp.lt.s32.totalorder %s2973_s16, %s2966_s28 }
  0x8f   : > { %p2969_p7 = pnand %p2967_p6, %p3296_p5 }
  0x90   : > { %p2976_p13 = por %p2975_p12, %p2974_p9 }
  0x91   : > { %p2970_p8 = pneg %p2969_p7 }
  0x93   : > { %p2977_p2 = pnand %p2976_p13, %p2970_p8 }
  0x95   : > { %2980 = shalt.err (!%p2977_p2)
}
  0x96   : > { %2768 = dma.hbm_to_vmem [thread:$0]  (!%p3282_p3), %s3903_s6, 16, %s3338_s30, [#allocation10]  }
  0x97   : > { %s3128_s2 = smov [#allocation14]   ;;  %s2981_s29 = scalar_lea.hbm %s3864_s13, 512 }
  0x98   : > { %s481_s21 = sshll.u32 %s3128_s2, 4  ;;  %p2982_p10 = scmp.ne.s32.totalorder %s3864_s13, %s2981_s29  ;;  %s482_s21 = int_to_ptr.vmem [resolvable:$true] %s481_s21 }
  0x99   : > { %p2988_p1 = scmp.lt.u32.totalorder %s2981_s29, %s3864_s13 }
  0x9a   : > { %p2984_p11 = pnand %p2982_p10, %p3296_p5 }
  0x9c   : > { %p2985_p0 = pneg %p2984_p11 }
  0x9e   : > { %p2990_p4 = pnand %p2988_p1, %p2985_p0 }
  0xa0   : > { %2993 = shalt.err (!%p2990_p4)
}
  0xa1   : > { %s2994_s30 = scalar_lea.vmem %s482_s21, 512  ;;  %p3002_p9 = scmp.lt.s32.totalorder %s482_s21, %s482_s21 }
  0xa2   : > { %p2995_p6 = scmp.ne.s32.totalorder %s482_s21, %s2994_s30  ;;  %p3003_p12 = scmp.lt.s32.totalorder %s2994_s30, %s2994_s30 }
  0xa4   : > { %p2997_p7 = pnand %p2995_p6, %p3296_p5  ;;  %p3004_p13 = por %p3003_p12, %p3002_p9 }
  0xa6   : > { %p2998_p8 = pneg %p2997_p7 }
  0xa8   : > { %p3005_p2 = pnand %p3004_p13, %p2998_p8 }
  0xaa   : > { %3008 = shalt.err (!%p3005_p2)
}
  0xab   : > { %s3904_s28 = smov 8   ;;  %s3905_s16 = smov 128  }
  0xac   : > { %2774 = dma.hbm_to_vmem [thread:$0]  (!%p3282_p3), %s3864_s13, 512, %s482_s21, [#allocation13], %s3905_s16, %s3905_s16, %s3904_s28  }
  0xad   : > { %p3906_p10 = scmp.ne.s32.totalorder %s3898_s22, 0 }
  0xae   : > { %p3907_p5 = scmp.eq.s32.totalorder (!%p3906_p10), %s3246_s4, 0 }
  0xaf   : > { %516 = sbr.rel (%p3906_p10) target bundleno = 3772 (0xebc), region = 76 }
  0xb6   : > { %3084 = dma.done.wait (%p3907_p5), [#allocation7], 128   ;;  %p3908_p11 = pmov %p3907_p5 }
  0xb7   : > { %p3909_p0 = pmov %p3907_p5 }
  0xb8   : > { %3086 = vsyncadd (%p3908_p11), [#allocation7], 4294967168 }
  0xb9   : > { %3088 = dma.done.wait (%p3909_p0), [#allocation10], 400   ;;  %p3910_p1 = pmov %p3909_p0 }
  0xba   : > { %p3911_p4 = pmov %p3909_p0 }
  0xbb   : > { %3090 = vsyncadd (%p3910_p1), [#allocation10], 4294966896 }
  0xbc   : > { %3092 = dma.done.wait (%p3911_p4), [#allocation13], 544   ;;  %p3912_p3 = pmov %p3909_p0 }
  0xbd   : > { %s3418_s22 = sshll.u32 %s3246_s4, 7  ;;  %v3129_v0 = vmov 0.0|0.0   ;;  %vm3130_vm0 = vmmov 0   ;;  %v3131_v1 = vmov 0.0   ;;  %vm604_vm1 = vcmask 253952   ;;  %v644_v2 = vld [vmem:[%s3856_s5] sm:$0xff] }
  0xbe   : > { %3094 = vsyncadd (%p3912_p3), [#allocation13], 4294966752  ;;  %2603 = vmatprep.subr.bf16.mxu1 %v3129_v0  ;;  %2387 = vmatprep.mubr.msk.f32.mxu1 %vm3130_vm0, %v3131_v1  ;;  %s601_s25 = sld [smem:[#allocation5 + %s3418_s22]]  ;;  %s606_s23 = sadd.s32 1, %s3418_s22  ;;  %v645_v3 = vld [vmem:[%s3856_s5 + $0x8] sm:$0xff]  ;;  %v646_v4 = vld [vmem:[%s3856_s5 + $0x10] sm:$0xff] }
  0xbf   : > { %s607_s2 = sld [smem:[#allocation5 + %s606_s23]]  ;;  %s611_s21 = sadd.s32 2, %s3418_s22  ;;  %2615 = vmatprep.subr.bf16.mxu0 %v3129_v0  ;;  %2409 = vmatprep.mubr.msk.f32.mxu0 %vm3130_vm0, %v3131_v1  ;;  %v2604_v5 = vpack.c.bf16 %v645_v3, %v644_v2  ;;  %v647_v6 = vld [vmem:[%s3856_s5 + $0x18] sm:$0xff]  ;;  %vm655_vm2 = vcmask 261120   ;;  %v2225_v19 = vld [vmem:[%s3858_s7 + $0x20] sm:$0xff]  ;;  %v2226_v20 = vld [vmem:[%s3858_s7 + $0x28] sm:$0xff] }
  0xc0   : > { %s612_s0 = sld [smem:[#allocation5 + %s611_s21]]  ;;  %s616_s14 = sadd.s32 3, %s3418_s22  ;;  %v2607_v9 = vpack.c.bf16 %v647_v6, %v646_v4  ;;  %v642_v16 = vld [vmem:[#allocation6] sm:$0xff]  ;;  %v2610_v21 = vpack.c.bf16 %v2226_v20, %v2225_v19  ;;  %v757_v22 = vld [vmem:[%s3858_s7] sm:$0xff]  ;;  %v758_v23 = vld [vmem:[%s3858_s7 + $0x8] sm:$0xff]  ;;  %vm749_vm3 = vcmask 254976  }
  0xc1   : > { %s617_s29 = sld [smem:[#allocation5 + %s616_s14]]  ;;  %s621_s26 = sadd.s32 4, %s3418_s22  ;;  %2605 = vmatpush3.bf16.msra.mxu1 %v2604_v5  ;;  %v2616_v24 = vpack.c.bf16 %v758_v23, %v757_v22  ;;  %v2227_v25 = vld [vmem:[%s3858_s7 + $0x30] sm:$0xff]  ;;  %v2228_v26 = vld [vmem:[%s3858_s7 + $0x38] sm:$0xff]  ;;  %v3132_v28 = vmov 1.0   ;;  %v2231_v36 = vld [vmem:[%s3858_s7 + $0x40] sm:$0xff] }
  0xc2   : > { %s3431_s18 = sld [smem:[#allocation5 + %s621_s26]]  ;;  %s626_s19 = sadd.s32 5, %s3418_s22  ;;  %2606 = vmatprep.subr.bf16.mxu1 %v3129_v0  ;;  %v759_v27 = vld [vmem:[%s3858_s7 + $0x10] sm:$0xff]  ;;  %750 = vst.msk [vmem:[#allocation3] sm:$0x3] %vm749_vm3, %v3132_v28  ;;  %v2613_v29 = vpack.c.bf16 %v2228_v26, %v2227_v25  ;;  %v760_v30 = vld [vmem:[%s3858_s7 + $0x18] sm:$0xff] }
  0xc3   : > { %s3434_s24 = sld [smem:[#allocation5 + %s626_s19]]  ;;  %s631_s30 = sadd.s32 6, %s3418_s22  ;;  %2617 = vmatpush3.bf16.msra.mxu0 %v2616_v24  ;;  %v2619_v31 = vpack.c.bf16 %v760_v30, %v759_v27  ;;  %v2223_v32 = vld [vmem:[#allocation11] ss:$0 sm:$0xff]  ;;  %v2232_v37 = vld [vmem:[%s3858_s7 + $0x48] sm:$0xff]  ;;  %v2233_v39 = vld [vmem:[%s3858_s7 + $0x50] sm:$0xff] }
  0xc4   : > { %s632_s14 = sld [smem:[#allocation5 + %s631_s30]]  ;;  %s602_s19 = scalar_lea.vmem [#allocation9], %s601_s25  ;;  %2618 = vmatprep.subr.bf16.mxu0 %v3129_v0  ;;  %v2622_v38 = vpack.c.bf16 %v2232_v37, %v2231_v36  ;;  %v2234_v40 = vld [vmem:[%s3858_s7 + $0x58] sm:$0xff]  ;;  %v1012_v45 = vld [vmem:[%s3860_s9] sm:$0xff]  ;;  %v1013_v46 = vld [vmem:[%s3860_s9 + $0x8] sm:$0xff] }
  0xc5   : > { %v603_v7 = vld [vmem:[%s602_s19] sm:$0x1]  ;;  %s636_s6 = sadd.s32 7, %s3418_s22  ;;  %s608_s28 = scalar_lea.vmem [#allocation9], %s607_s2  ;;  %2608 = vmatpush3.bf16.msra.mxu1 %v2607_v9  ;;  %v2625_v43 = vpack.c.bf16 %v2234_v40, %v2233_v39  ;;  %v1014_v47 = vld [vmem:[%s3860_s9 + $0x10] sm:$0xff]  ;;  %v3532_v48 = vpack.c.bf16 %v1013_v46, %v1012_v45  ;;  %v1015_v49 = vld [vmem:[%s3860_s9 + $0x18] sm:$0xff] }
  0xc6   : > { %605 = vst.msk [vmem:[#allocation2] sm:$0x1] %vm604_vm1, %v603_v7  ;;  %v609_v8 = vld [vmem:[%s608_s28] sm:$0x1]  ;;  %s637_s16 = sld [smem:[#allocation5 + %s636_s6]]  ;;  %s613_s30 = scalar_lea.vmem [#allocation9], %s612_s0  ;;  %2609 = vmatprep.subr.bf16.mxu1 %v3129_v0  ;;  %v3538_v50 = vpack.c.bf16 %v1015_v49, %v1014_v47 }
  0xc7   : > { %610 = vst.msk [vmem:[#allocation2 + $0x1] sm:$0x1] %vm604_vm1, %v609_v8  ;;  %v614_v10 = vld [vmem:[%s613_s30] sm:$0x1]  ;;  %s618_s1 = scalar_lea.vmem [#allocation9], %s617_s29  ;;  %2620 = vmatpush3.bf16.msra.mxu0 %v2619_v31  ;;  %p590_p6 = scmp.lt.s32.totalorder %s3246_s4, 1 }
  0xc8   : > { %615 = vst.msk [vmem:[#allocation2 + $0x2] sm:$0x1] %vm604_vm1, %v614_v10  ;;  %v619_v11 = vld [vmem:[%s618_s1] sm:$0x1]  ;;  %s623_s25 = scalar_lea.vmem [#allocation9], %s3431_s18  ;;  %2627 = vmatprep.subr.bf16.mxu0 %v3129_v0  ;;  %s3913_s21 = sld [smem:[#allocation33_spill]] }
  0xc9   : > { %620 = vst.msk [vmem:[#allocation2 + $0x3] sm:$0x1] %vm604_vm1, %v619_v11  ;;  %v624_v12 = vld [vmem:[%s623_s25] sm:$0x1]  ;;  %s628_s2 = scalar_lea.vmem [#allocation9], %s3434_s24  ;;  %s3133_s25 = smov 96  }
  0xca   : > { %625 = vst.msk [vmem:[#allocation2 + $0x4] sm:$0x1] %vm604_vm1, %v624_v12  ;;  %v629_v13 = vld [vmem:[%s628_s2] sm:$0x1]  ;;  %s633_s6 = scalar_lea.vmem [#allocation9], %s632_s14  ;;  %s3929_s4 = smov (!%p590_p6, %s3246_s4), 1 }
  0xcb   : > { %630 = vst.msk [vmem:[#allocation2 + $0x5] sm:$0x1] %vm604_vm1, %v629_v13  ;;  %v634_v14 = vld [vmem:[%s633_s6] sm:$0x1]  ;;  %v2236_v57 = vld [vmem:[#allocation12] ss:$0 sm:$0xff] }
  0xcc   : > { %635 = vst.msk [vmem:[#allocation2 + $0x6] sm:$0x1] %vm604_vm1, %v634_v14  ;;  %s638_s0 = scalar_lea.vmem [#allocation9], %s637_s16  ;;  %s2273_s2 = sshll.u32 %s3929_s4, 5  ;;  %v3569_v11 = vld [vmem:[%s3861_s10] ss:$0 sm:$0xff] }
  0xcd   : > { %v639_v15 = vld [vmem:[%s638_s0] sm:$0x1]  ;;  %s594_s29 = scalar_lea.vmem %s3854_s3, %s2273_s2  ;;  %v3134_v20 = vmov -1e+30   ;;  %s2274_s17 = sshll.u32 %s3929_s4, 7 }
  0xce   : > { %640 = vst.msk [vmem:[#allocation2 + $0x7] sm:$0x1] %vm604_vm1, %v639_v15  ;;  %v729_v5 = vld [vmem:[%s594_s29] sm:$0xff]  ;;  %v730_v6 = vld [vmem:[%s594_s29 + $0x8] sm:$0xff]  ;;  %v731_v8 = vld [vmem:[%s594_s29 + $0x10] sm:$0xff]  ;;  %s3583_s14 = scalar_lea.vmem %s3913_s21, %s2274_s17  ;;  %s3914_s28 = sld [smem:[#allocation37_spill]] }
  0xcf   : > { %v3558_v7 = vpack.c.bf16 %v730_v6, %v729_v5  ;;  %v732_v9 = vld [vmem:[%s594_s29 + $0x18] sm:$0xff]  ;;  %v733_v25 = vld [vmem:[%s3583_s14] sm:$0xff]  ;;  %v734_v26 = vld [vmem:[%s3583_s14 + $0x8] sm:$0xff]  ;;  %p3916_p8 = scmp.ne.s32.totalorder %s3895_s20, 0  ;;  %s3135_s6 = smov [#allocation16]  }
  0xd0   : > { %v3562_v10 = vpack.c.bf16 %v732_v9, %v731_v8  ;;  %v735_v27 = vld [vmem:[%s3583_s14 + $0x10] sm:$0xff]  ;;  %v3588_v28 = vpack.c.bf16 %v734_v26, %v733_v25  ;;  %v737_v31 = vld [vmem:[%s3583_s14 + $0x20] sm:$0xff]  ;;  %v740_v36 = vld [vmem:[%s3583_s14 + $0x38] sm:$0xff]  ;;  %s3013_s0 = sshll.u32 %s3135_s6, 4  ;;  %s3014_s0 = int_to_ptr.vmem [resolvable:$false] %s3013_s0 }
  0xd1   : > { %v742_v39 = vld [vmem:[%s3583_s14 + $0x48] sm:$0xff]  ;;  %v743_v45 = vld [vmem:[%s3583_s14 + $0x50] sm:$0xff]  ;;  %v744_v46 = vld [vmem:[%s3583_s14 + $0x58] sm:$0xff]  ;;  %s3015_s29 = scalar_lea.vmem %s3014_s0, 256 }
  0xd2   : > { %v3617_v47 = vpack.c.bf16 %v744_v46, %v743_v45  ;;  %v745_v49 = vld [vmem:[%s3583_s14 + $0x60] sm:$0xff]  ;;  %v2248_v6 = vld [vmem:[%s3858_s7 + $0x88] sm:$0xff]  ;;  %v2250_v9 = vld [vmem:[%s3858_s7 + $0x98] sm:$0xff] }
  0xd4   : > { %s3915_s16 = smov %s3914_s28  ;;  %s3779_s30 = scalar_lea.hbm %s3914_s28, %s3418_s22 }
  0xd5   : > { %v641_v17 = vld [vmem:[#allocation2] sm:$0xff] }
  0xd6   : > { %v3462_v18 = vadd.f32 %v642_v16, %v641_v17  ;;  %v751_v17 = vlaneseq }
  0xd8   : > { %2388 = vmatmul.mubr.msk.f32.vlgmr.msra.gmra.mrb[0].mxu1 %vm655_vm2, %v3462_v18  ;;  %v752_v19 = vand.u32 127, %v751_v17 }
  0xd9   : > { %2398 = vmatprep.mubr.msk.f32.mxu1 %vm3130_vm0, %v3131_v1  ;;  %2611 = vmatpush3.bf16.msra.mxu1 %v2610_v21 }
  0xda   : > { %2612 = vmatprep.subr.bf16.mxu1 %v3129_v0  ;;  %vm753_vm4 = vcmp.lt.s32.totalorder %v752_v19, 10 }
  0xdb   : > { %v3576_v21 = vsel %vm753_vm4, 0.0, %v3134_v20 }
  0xdd   : > { %2614 = vmatpush3.bf16.msra.mxu1 %v2613_v29  ;;  %v736_v29 = vld [vmem:[%s3583_s14 + $0x18] sm:$0xff] }
  0xde   : > { %2621 = vmatprep.subr.bf16.mxu1 %v3129_v0  ;;  %v3592_v30 = vpack.c.bf16 %v736_v29, %v735_v27  ;;  %v2253_v29 = vld [vmem:[%s3858_s7 + $0xa0] sm:$0xff] }
 0x1ab   : > { %v725_v33 = vpop.f32.mrb[0].mxu1 }
 0x1ac   : > { %v3496_v34 = vadd.f32 %v2223_v32, %v725_v33  ;;  %v2389_v35 = vpop.f32.mrb[1].mxu1  ;;  %v738_v32 = vld [vmem:[%s3583_s14 + $0x28] sm:$0xff] }
 0x1ad   : > { %v3598_v33 = vpack.c.bf16 %v738_v32, %v737_v31  ;;  %v739_v35 = vld [vmem:[%s3583_s14 + $0x30] sm:$0xff]  ;;  %v2254_v31 = vld [vmem:[%s3858_s7 + $0xa8] sm:$0xff] }
 0x1ae   : > { %755 = vst.msk [vmem:[#allocation3 + $0x2] sm:$0xff] %vm655_vm2, %v3496_v34  ;;  %v3604_v37 = vpack.c.bf16 %v740_v36, %v739_v35  ;;  %v2682_v32 = vpack.c.bf16 %v2254_v31, %v2253_v29  ;;  %v2255_v35 = vld [vmem:[%s3858_s7 + $0xb0] sm:$0xff]  ;;  %v2256_v36 = vld [vmem:[%s3858_s7 + $0xb8] sm:$0xff] }
 0x1b5   : > { %v761_v41 = vld [vmem:[#allocation3 + $0x1] sm:$0xff] }
 0x1b6   : > { %v756_v42 = vld [vmem:[#allocation3] sm:$0xff]  ;;  %2399 = vmatmul.mubr.msk.f32.vlgmr.msra.gmra.mrb[2].mxu1 %vm655_vm2, %v761_v41 }
 0x1b7   : > { %2410 = vmatmul.mubr.msk.f32.vlgmr.msra.gmra.mrb[0].mxu0 %vm655_vm2, %v756_v42  ;;  %2623 = vmatpush3.bf16.msra.mxu1 %v2622_v38  ;;  %v913_v44 = vld [vmem:[#allocation3 + $0x2] sm:$0xff]  ;;  %v741_v38 = vld [vmem:[%s3583_s14 + $0x40] sm:$0xff] }
 0x1b8   : > { %2420 = vmatprep.mubr.msk.f32.mxu1 %vm3130_vm0, %v3131_v1  ;;  %2624 = vmatprep.subr.bf16.mxu1 %v3129_v0  ;;  %v3610_v40 = vpack.c.bf16 %v742_v39, %v741_v38  ;;  %v2685_v39 = vpack.c.bf16 %v2256_v36, %v2255_v35 }
 0x1b9   : > { %2431 = vmatprep.mubr.msk.f32.mxu0 %vm3130_vm0, %v3131_v1  ;;  %2629 = vmatpush3.bf16.msra.mxu0 %v3532_v48 }
 0x1ba   : > { %2630 = vmatprep.subr.bf16.mxu0 %v3129_v0 }
 0x1bb   : > { %2626 = vmatpush3.bf16.msra.mxu1 %v2625_v43 }
 0x1bc   : > { %2633 = vmatprep.subr.bf16.mxu1 %v3129_v0 }
 0x1bd   : > { %2632 = vmatpush3.bf16.msra.mxu0 %v3538_v50 }
 0x1be   : > { %2421 = vmatmul.mubr.msk.f32.vlgmr.msra.gmra.mrb[4].mxu1 %vm655_vm2, %v913_v44  ;;  %2639 = vmatprep.subr.bf16.mxu0 %v3129_v0 }
 0x1bf   : > { %2442 = vmatprep.mubr.msk.f32.mxu1 %vm3130_vm0, %v3131_v1  ;;  %2635 = vmatpush3.bf16.msra.mxu1 %v3558_v7 }
 0x1c0   : > { %2636 = vmatprep.subr.bf16.mxu1 %v3129_v0 }
 0x1c3   : > { %2638 = vmatpush3.bf16.msra.mxu1 %v3562_v10 }
 0x1c4   : > { %2663 = vmatprep.subr.bf16.mxu1 %v3129_v0 }
 0x289   : > { %v836_v51 = vpop.f32.mrb[2].mxu1 }
 0x28a   : > { %v909_v52 = vpop.f32.mrb[0].mxu0  ;;  %v2400_v54 = vpop.f32.mrb[3].mxu1 }
 0x28b   : > { %v910_v53 = vadd.f32 %v909_v52, %v836_v51  ;;  %v2411_v55 = vpop.f32.mrb[1].mxu0  ;;  %v746_v51 = vld [vmem:[%s3583_s14 + $0x68] sm:$0xff]  ;;  %v748_v54 = vld [vmem:[%s3583_s14 + $0x78] sm:$0xff] }
 0x28c   : > { %v3622_v52 = vpack.c.bf16 %v746_v51, %v745_v49  ;;  %v2258_v51 = vld [vmem:[#allocation12 + $0x1] ss:$0 sm:$0xff] }
 0x291   : > { %v988_v56 = vpop.f32.mrb[4].mxu1 }
 0x292   : > { %v992_v58 = vadd.f32 %v988_v56, %v910_v53  ;;  %v2422_v59 = vpop.f32.mrb[5].mxu1  ;;  %v747_v53 = vld [vmem:[%s3583_s14 + $0x70] sm:$0xff]  ;;  %v1250_v56 = vld [vmem:[%s3862_s11] sm:$0xff] }
 0x293   : > { %v3628_v55 = vpack.c.bf16 %v748_v54, %v747_v53 }
 0x294   : > { %v1000_v60 = vadd.f32 %v2236_v57, %v992_v58  ;;  %v1251_v57 = vld [vmem:[%s3862_s11 + $0x8] sm:$0xff]  ;;  %v1252_v58 = vld [vmem:[%s3862_s11 + $0x10] sm:$0xff] }
 0x295   : > { %v3642_v59 = vpack.c.bf16 %v1251_v57, %v1250_v56 }
 0x296   : > { %v2237_v61 = vmul.f32 -1.442695, %v1000_v60 }
 0x298   : > { %2841 = vpow2.f32 %v2237_v61 }
 0x2a2   : > { %v2842_v62 = vpop.eup %2841 }
 0x2a3   : > { %v1004_v63 = vadd.f32 1.0, %v2842_v62 }
 0x2a5   : > { %2843 = vrcp.f32 %v1004_v63 }
 0x2af   : > { %v2844_v2 = vpop.eup %2843 }
 0x2b0   : > { %1008 = vrot.lane.b32.xlu0 %v2844_v2, %s3133_s25 }
 0x322   : > { %v1009_v3 = vpop.permute.xlu0 %1008 }
 0x323   : > { %v3544_v4 = vmul.f32 %v1009_v3, %v1000_v60  ;;  %v1253_v60 = vld [vmem:[%s3862_s11 + $0x18] sm:$0xff] }
 0x324   : > { %v3648_v61 = vpack.c.bf16 %v1253_v60, %v1252_v58 }
 0x325   : > { %2432 = vmatmul.mubr.msk.f32.vlgmr.msra.gmra.mrb[2].mxu0 %vm655_vm2, %v3544_v4 }
 0x326   : > { %2477 = vmatprep.mubr.msk.f32.mxu0 %vm3130_vm0, %v3131_v1  ;;  %2641 = vmatpush3.bf16.msra.mxu0 %v3588_v28 }
 0x327   : > { %2642 = vmatprep.subr.bf16.mxu0 %v3129_v0 }
 0x32a   : > { %2644 = vmatpush3.bf16.msra.mxu0 %v3592_v30 }
 0x32b   : > { %2645 = vmatprep.subr.bf16.mxu0 %v3129_v0 }
 0x32e   : > { %2647 = vmatpush3.bf16.msra.mxu0 %v3598_v33 }
 0x32f   : > { %2648 = vmatprep.subr.bf16.mxu0 %v3129_v0 }
 0x332   : > { %2650 = vmatpush3.bf16.msra.mxu0 %v3604_v37 }
 0x333   : > { %2651 = vmatprep.subr.bf16.mxu0 %v3129_v0 }
 0x336   : > { %2653 = vmatpush3.bf16.msra.mxu0 %v3610_v40 }
 0x337   : > { %2654 = vmatprep.subr.bf16.mxu0 %v3129_v0 }
 0x33a   : > { %2656 = vmatpush3.bf16.msra.mxu0 %v3617_v47 }
 0x33b   : > { %2657 = vmatprep.subr.bf16.mxu0 %v3129_v0 }
 0x33e   : > { %2659 = vmatpush3.bf16.msra.mxu0 %v3622_v52 }
 0x33f   : > { %2660 = vmatprep.subr.bf16.mxu0 %v3129_v0 }
 0x342   : > { %2662 = vmatpush3.bf16.msra.mxu0 %v3628_v55 }
 0x343   : > { %2687 = vmatprep.subr.bf16.mxu0 %v3129_v0 }
 0x3f8   : > { %v1092_v12 = vpop.f32.mrb[2].mxu0 }
 0x3f9   : > { %v1093_v13 = vadd.f32 %v3569_v11, %v1092_v12  ;;  %v2433_v14 = vpop.f32.mrb[3].mxu0 }
 0x3fb   : > { %v1096_v15 = vadd.f32 %v1093_v13, %v3462_v18  ;;  %v3679_v13 = vld [vmem:[%s3863_s12] ss:$0 sm:$0xff] }
 0x3fd   : > { %v1097_v16 = vmul.f32 0.70710677, %v1096_v15 }
 0x3ff   : > { %2443 = vmatmul.mubr.msk.f32.vlgmr.msra.gmra.mrb[6].mxu1 %vm655_vm2, %v1097_v16 }
 0x400   : > { %2488 = vmatprep.mubr.msk.f32.mxu1 %vm3130_vm0, %v3131_v1  ;;  %2665 = vmatpush3.bf16.msra.mxu1 %v3642_v59 }
 0x401   : > { %2666 = vmatprep.subr.bf16.mxu1 %v3129_v0 }
 0x404   : > { %2668 = vmatpush3.bf16.msra.mxu1 %v3648_v61 }
 0x405   : > { %2669 = vmatprep.subr.bf16.mxu1 %v3129_v0 }
 0x4d2   : > { %v1167_v22 = vpop.f32.mrb[6].mxu1 }
 0x4d3   : > { %v1168_v23 = vadd.f32 %v1167_v22, %v3576_v21  ;;  %v2444_v24 = vpop.f32.mrb[7].mxu1 }
 0x4d4   : > { %v2244_v24 = vld [vmem:[%s3858_s7 + $0x68] sm:$0xff] }
 0x4d5   : > { %1171 = vmax.xlane.f32.xlu0 %v1168_v23 }
 0x562   : > { %v1172_v41 = vpop.xlane.xlu0 %1171 }
 0x563   : > { %v1173_v42 = vsub.f32 %v1168_v23, %v1172_v41  ;;  %v2243_v23 = vld [vmem:[%s3858_s7 + $0x60] sm:$0xff] }
 0x564   : > { %v2676_v25 = vpack.c.bf16 %v2244_v24, %v2243_v23 }
 0x565   : > { %v1174_v43 = vmul.f32 1.442695, %v1173_v42 }
 0x567   : > { %2845 = vpow2.f32 %v1174_v43 }
 0x571   : > { %v2846_v44 = vpop.eup %2845 }
 0x572   : > { %1176 = vadd.xlane.f32.xlu1 %v2846_v44 }
 0x5ff   : > { %v1177_v62 = vpop.xlane.xlu1 %1176 }
 0x600   : > { %2847 = vrcp.f32 %v1177_v62 }
 0x60a   : > { %v2848_v63 = vpop.eup %2847 }
 0x60b   : > { %v1179_v2 = vmul.f32 %v2848_v63, %v2846_v44 }
 0x60d   : > { %2478 = vmatmul.mubr.f32.vlgmr.msra.gmra.mrb[4].mxu0 %v1179_v2 }
 0x60e   : > { %2689 = vmatpush3.bf16.msra.mxu0 %v3532_v48  ;;  %2532 = vmatprep.mubr.msk.f32.mxu0 %vm3130_vm0, %v3131_v1  ;;  %v2247_v48 = vld [vmem:[%s3858_s7 + $0x80] sm:$0xff] }
 0x60f   : > { %2690 = vmatprep.subr.bf16.mxu0 %v3129_v0  ;;  %v2670_v8 = vpack.c.bf16 %v2248_v6, %v2247_v48  ;;  %v1923_v48 = vld [vmem:[#allocation14] sm:$0xff]  ;;  %v1924_v6 = vld [vmem:[#allocation14 + $0x8] sm:$0xff] }
 0x612   : > { %2692 = vmatpush3.bf16.msra.mxu0 %v3538_v50  ;;  %v2249_v50 = vld [vmem:[%s3858_s7 + $0x90] sm:$0xff] }
 0x613   : > { %2699 = vmatprep.subr.bf16.mxu0 %v3129_v0  ;;  %v2673_v12 = vpack.c.bf16 %v2250_v9, %v2249_v50  ;;  %v1925_v50 = vld [vmem:[#allocation14 + $0x10] sm:$0xff]  ;;  %v1926_v9 = vld [vmem:[#allocation14 + $0x18] sm:$0xff] }
 0x6e0   : > { %v1246_v3 = vpop.f32.mrb[4].mxu0 }
 0x6e1   : > { %v2479_v5 = vpop.f32.mrb[5].mxu0  ;;  %2489 = vmatmul.mubr.msk.f32.vlgmr.msra.gmra.mrb[8].mxu1 %vm655_vm2, %v1246_v3 }
 0x6e2   : > { %2499 = vmatprep.mubr.msk.f32.mxu1 %vm3130_vm0, %v3131_v1  ;;  %2671 = vmatpush3.bf16.msra.mxu1 %v2670_v8  ;;  %v2730_v8 = vpack.c.bf16 %v1924_v6, %v1923_v48 }
 0x6e3   : > { %2672 = vmatprep.subr.bf16.mxu1 %v3129_v0 }
 0x6e6   : > { %2674 = vmatpush3.bf16.msra.mxu1 %v2673_v12  ;;  %v2733_v12 = vpack.c.bf16 %v1926_v9, %v1925_v50 }
 0x6e7   : > { %2675 = vmatprep.subr.bf16.mxu1 %v3129_v0 }
 0x7b4   : > { %v1330_v14 = vpop.f32.mrb[8].mxu1 }
 0x7b5   : > { %v1331_v15 = vadd.f32 %v3679_v13, %v1330_v14  ;;  %v2490_v16 = vpop.f32.mrb[9].mxu1 }
 0x7b7   : > { %v1334_v17 = vadd.f32 %v1331_v15, %v3544_v4  ;;  %v2245_v4 = vld [vmem:[%s3858_s7 + $0x70] sm:$0xff] }
 0x7b9   : > { %v1335_v19 = vmul.f32 0.70710677, %v1334_v17 }
 0x7bb   : > { %v1336_v20 = vadd.f32 %v1335_v19, %v3496_v34  ;;  %v2246_v34 = vld [vmem:[%s3858_s7 + $0x78] sm:$0xff] }
 0x7bc   : > { %v2679_v27 = vpack.c.bf16 %v2246_v34, %v2245_v4 }
 0x7bd   : > { %v3684_v22 = vmul.f32 0.70710677, %v1336_v20 }
 0x7bf   : > { %1338 = vst.msk [vmem:[#allocation3 + $0x2] sm:$0xff] %vm655_vm2, %v3684_v22 }
 0x7c6   : > { %v1345_v26 = vld [vmem:[#allocation3 + $0x1] sm:$0xff] }
 0x7c7   : > { %2500 = vmatmul.mubr.msk.f32.vlgmr.msra.gmra.mrb[10].mxu1 %vm655_vm2, %v1345_v26  ;;  %v1339_v38 = vld [vmem:[#allocation3] sm:$0xff] }
 0x7c8   : > { %2677 = vmatpush3.bf16.msra.mxu1 %v2676_v25  ;;  %2510 = vmatprep.mubr.msk.f32.mxu1 %vm3130_vm0, %v3131_v1  ;;  %v1497_v41 = vld [vmem:[#allocation3 + $0x2] sm:$0xff] }
 0x7c9   : > { %2678 = vmatprep.subr.bf16.mxu1 %v3129_v0 }
 0x7cc   : > { %2680 = vmatpush3.bf16.msra.mxu1 %v2679_v27 }
 0x7cd   : > { %2681 = vmatprep.subr.bf16.mxu1 %v3129_v0 }
 0x7cf   : > { %2511 = vmatmul.mubr.msk.f32.vlgmr.msra.gmra.mrb[12].mxu1 %vm655_vm2, %v1339_v38 }
 0x7d0   : > { %2683 = vmatpush3.bf16.msra.mxu1 %v2682_v32  ;;  %2521 = vmatprep.mubr.msk.f32.mxu1 %vm3130_vm0, %v3131_v1 }
 0x7d1   : > { %2684 = vmatprep.subr.bf16.mxu1 %v3129_v0 }
 0x7d4   : > { %2686 = vmatpush3.bf16.msra.mxu1 %v2685_v39 }
 0x7d5   : > { %2693 = vmatprep.subr.bf16.mxu1 %v3129_v0 }
 0x7d7   : > { %2522 = vmatmul.mubr.msk.f32.vlgmr.msra.gmra.mrb[14].mxu1 %vm655_vm2, %v1497_v41 }
 0x7d8   : > { %2695 = vmatpush3.bf16.msra.mxu1 %v3558_v7  ;;  %2543 = vmatprep.mubr.msk.f32.mxu1 %vm3130_vm0, %v3131_v1 }
 0x7d9   : > { %2696 = vmatprep.subr.bf16.mxu1 %v3129_v0 }
 0x7dc   : > { %2698 = vmatpush3.bf16.msra.mxu1 %v3562_v10 }
 0x7dd   : > { %2723 = vmatprep.subr.bf16.mxu1 %v3129_v0 }
 0x89a   : > { %v1420_v42 = vpop.f32.mrb[10].mxu1 }
 0x89b   : > { %v2501_v43 = vpop.f32.mrb[11].mxu1 }
 0x8a2   : > { %v1493_v44 = vpop.f32.mrb[12].mxu1 }
 0x8a3   : > { %v1494_v45 = vadd.f32 %v1493_v44, %v1420_v42  ;;  %v2512_v46 = vpop.f32.mrb[13].mxu1 }
 0x8aa   : > { %v1572_v49 = vpop.f32.mrb[14].mxu1 }
 0x8ab   : > { %v1576_v53 = vadd.f32 %v1572_v49, %v1494_v45  ;;  %v2523_v54 = vpop.f32.mrb[15].mxu1 }
 0x8ad   : > { %v1585_v56 = vadd.f32 %v2258_v51, %v1576_v53 }
 0x8af   : > { %v2259_v7 = vmul.f32 -1.442695, %v1585_v56 }
 0x8b1   : > { %2849 = vpow2.f32 %v2259_v7 }
 0x8bb   : > { %v2850_v57 = vpop.eup %2849 }
 0x8bc   : > { %v1589_v58 = vadd.f32 1.0, %v2850_v57 }
 0x8be   : > { %2851 = vrcp.f32 %v1589_v58 }
 0x8c8   : > { %v2852_v60 = vpop.eup %2851 }
 0x8c9   : > { %1593 = vrot.lane.b32.xlu1 %v2852_v60, %s3133_s25  ;;  %s3762_s25 = sand.u32 1, %s3109_s27  }
 0x8ca   : > { %s2216_s21 = sshll.u32 %s3762_s25, 3  ;;  %s2015_s1 = scalar_lea.sflag [#allocation17], %s3762_s25 }
 0x8cb   : > { %s589_s14 = scalar_lea.vmem [#allocation16], %s2216_s21 }
 0x8cc   : > { %s2041_s4 = sshll.u32 %s589_s14, 4  ;;  %s2042_s4 = int_to_ptr.vmem [resolvable:$true] %s2041_s4 }
 0x8cd   : > { %s3009_s2 = scalar_lea.vmem %s2042_s4, 128  ;;  %p3016_p13 = scmp.lt.s32.totalorder %s2042_s4, %s3014_s0 }
 0x8ce   : > { %p3010_p7 = scmp.ne.s32.totalorder %s2042_s4, %s3009_s2  ;;  %p3017_p2 = scmp.lt.s32.totalorder %s3015_s29, %s3009_s2 }
 0x8d0   : > { %p3011_p9 = pnand %p3010_p7, %p3916_p8  ;;  %p3018_p10 = por %p3017_p2, %p3016_p13 }
 0x8d2   : > { %p3012_p12 = pneg %p3011_p9 }
 0x8d4   : > { %p3019_p5 = pnand %p3018_p10, %p3012_p12 }
 0x93b   : > { %v1594_v10 = vpop.permute.xlu1 %1593 }
 0x93c   : > { %v3730_v62 = vmul.f32 %v1594_v10, %v1585_v56 }
 0x93e   : > { %2533 = vmatmul.mubr.msk.f32.vlgmr.msra.gmra.mrb[6].mxu0 %vm655_vm2, %v3730_v62 }
 0x93f   : > { %2701 = vmatpush3.bf16.msra.mxu0 %v3588_v28  ;;  %2578 = vmatprep.mubr.msk.f32.mxu0 %vm3130_vm0, %v3131_v1 }
 0x940   : > { %2702 = vmatprep.subr.bf16.mxu0 %v3129_v0 }
 0x943   : > { %2704 = vmatpush3.bf16.msra.mxu0 %v3592_v30 }
 0x944   : > { %2705 = vmatprep.subr.bf16.mxu0 %v3129_v0 }
 0x947   : > { %2707 = vmatpush3.bf16.msra.mxu0 %v3598_v33 }
 0x948   : > { %2708 = vmatprep.subr.bf16.mxu0 %v3129_v0 }
 0x94b   : > { %2710 = vmatpush3.bf16.msra.mxu0 %v3604_v37 }
 0x94c   : > { %2711 = vmatprep.subr.bf16.mxu0 %v3129_v0 }
 0x94f   : > { %2713 = vmatpush3.bf16.msra.mxu0 %v3610_v40 }
 0x950   : > { %2714 = vmatprep.subr.bf16.mxu0 %v3129_v0 }
 0x953   : > { %2716 = vmatpush3.bf16.msra.mxu0 %v3617_v47 }
 0x954   : > { %2717 = vmatprep.subr.bf16.mxu0 %v3129_v0 }
 0x957   : > { %2719 = vmatpush3.bf16.msra.mxu0 %v3622_v52 }
 0x958   : > { %2720 = vmatprep.subr.bf16.mxu0 %v3129_v0 }
 0x95b   : > { %2722 = vmatpush3.bf16.msra.mxu0 %v3628_v55 }
 0xa11   : > { %v1677_v28 = vpop.f32.mrb[6].mxu0 }
 0xa12   : > { %v1678_v30 = vadd.f32 %v3569_v11, %v1677_v28  ;;  %v2534_v33 = vpop.f32.mrb[7].mxu0 }
 0xa14   : > { %v1681_v37 = vadd.f32 %v1678_v30, %v3462_v18 }
 0xa16   : > { %v1682_v63 = vmul.f32 0.70710677, %v1681_v37 }
 0xa18   : > { %2544 = vmatmul.mubr.msk.f32.vlgmr.msra.gmra.mrb[16].mxu1 %vm655_vm2, %v1682_v63 }
 0xa19   : > { %2725 = vmatpush3.bf16.msra.mxu1 %v3642_v59  ;;  %2589 = vmatprep.mubr.msk.f32.mxu1 %vm3130_vm0, %v3131_v1 }
 0xa1a   : > { %2726 = vmatprep.subr.bf16.mxu1 %v3129_v0 }
 0xa1d   : > { %2728 = vmatpush3.bf16.msra.mxu1 %v3648_v61 }
 0xa1e   : > { %2729 = vmatprep.subr.bf16.mxu1 %v3129_v0 }
 0xaeb   : > { %v1752_v40 = vpop.f32.mrb[16].mxu1 }
 0xaec   : > { %v1753_v11 = vadd.f32 %v1752_v40, %v3576_v21  ;;  %v2545_v47 = vpop.f32.mrb[17].mxu1 }
 0xaee   : > { %1756 = vmax.xlane.f32.xlu1 %v1753_v11 }
 0xb7b   : > { %v1757_v18 = vpop.xlane.xlu1 %1756 }
 0xb7c   : > { %v1758_v52 = vsub.f32 %v1753_v11, %v1757_v18 }
 0xb7e   : > { %v1759_v55 = vmul.f32 1.442695, %v1758_v52 }
 0xb80   : > { %2853 = vpow2.f32 %v1759_v55 }
 0xb8a   : > { %v2854_v59 = vpop.eup %2853 }
 0xb8b   : > { %1761 = vadd.xlane.f32.xlu0 %v2854_v59 }
 0xc18   : > { %v1762_v2 = vpop.xlane.xlu0 %1761 }
 0xc19   : > { %2855 = vrcp.f32 %v1762_v2 }
 0xc23   : > { %v2856_v61 = vpop.eup %2855 }
 0xc24   : > { %v1764_v3 = vmul.f32 %v2856_v61, %v2854_v59 }
 0xc26   : > { %2579 = vmatmul.mubr.f32.vlgmr.msra.gmra.mrb[8].mxu0 %v1764_v3  ;;  %2008 = vst [vmem:[%s589_s14] sm:$0xff] %v1764_v3 }
 0xcf9   : > { %v1831_v21 = vpop.f32.mrb[8].mxu0 }
 0xcfa   : > { %v2580_v5 = vpop.f32.mrb[9].mxu0  ;;  %2590 = vmatmul.mubr.msk.f32.vlgmr.msra.gmra.mrb[18].mxu1 %vm655_vm2, %v1831_v21 }
 0xcfb   : > { %2600 = vmatprep.mubr.msk.f32.mxu1 %vm3130_vm0, %v3131_v1  ;;  %2731 = vmatpush3.bf16.msra.mxu1 %v2730_v8 }
 0xcfc   : > { %2732 = vmatprep.subr.bf16.mxu1 %v3129_v0 }
 0xcff   : > { %2734 = vmatpush3.bf16.msra.mxu1 %v2733_v12 }
 0xdcd   : > { %v1915_v14 = vpop.f32.mrb[18].mxu1 }
 0xdce   : > { %v1916_v15 = vadd.f32 %v3679_v13, %v1915_v14  ;;  %v2591_v16 = vpop.f32.mrb[19].mxu1 }
 0xdd0   : > { %v1919_v17 = vadd.f32 %v1916_v15, %v3730_v62 }
 0xdd2   : > { %v1920_v1 = vmul.f32 0.70710677, %v1919_v17 }
 0xdd4   : > { %v1921_v19 = vadd.f32 %v1920_v1, %v3684_v22 }
 0xdd6   : > { %v1922_v20 = vmul.f32 0.70710677, %v1921_v19 }
 0xdd8   : > { %2601 = vmatmul.mubr.msk.f32.vlgmr.msra.gmra.mrb[20].mxu1 %vm655_vm2, %v1922_v20 }
 0xdd9   : > { %3022 = shalt.err (!%p3019_p5)
}
 0xdda   : > { %s3023_s18 = scalar_lea.hbm %s3779_s30, 128  ;;  %s3027_s15 = scalar_lea.hbm %s3915_s16, 256 }
 0xddb   : > { %p3024_p11 = scmp.ne.s32.totalorder %s3779_s30, %s3023_s18  ;;  %p3028_p4 = scmp.lt.u32.totalorder %s3779_s30, %s3915_s16 }
 0xddc   : > { %p3029_p3 = scmp.lt.u32.totalorder %s3027_s15, %s3023_s18  ;;  %p3031_p7 = scmp.lt.u32.totalorder %s3023_s18, %s3779_s30 }
 0xddd   : > { %p3025_p0 = pnand %p3024_p11, %p3916_p8 }
 0xdde   : > { %p3030_p6 = por %p3029_p3, %p3028_p4 }
 0xddf   : > { %p3026_p1 = pneg %p3025_p0 }
 0xde0   : > { %p3032_p9 = por %p3031_p7, %p3030_p6 }
 0xde2   : > { %p3033_p12 = pnand %p3032_p9, %p3026_p1 }
 0xde4   : > { %3036 = shalt.err (!%p3033_p12)
}
 0xde5   : > { %2756 = dma.vmem_to_hbm [thread:$0]  (%p3916_p8), %s2042_s4, 128, %s3779_s30, %s2015_s1  }
 0xde6   : > { %s3917_s28 = sld [smem:[#allocation35_spill]]  ;;  %s582_s2 = scalar_lea.vmem [#allocation15], %s2216_s21 }
 0xde7   : > { %s2028_s6 = sshll.u32 %s582_s2, 4  ;;  %s3918_s18 = sld [smem:[#allocation36_spill]]  ;;  %s3810_s6 = int_to_ptr.vmem [resolvable:$true] %s2028_s6 }
 0xde8   : > { %s2010_s4 = scalar_lea.sflag [#allocation8], %s3762_s25  ;;  %s3037_s30 = scalar_lea.vmem %s3810_s6, 128 }
 0xde9   : > { %p3038_p13 = scmp.ne.s32.totalorder %s3810_s6, %s3037_s30  ;;  %s3136_s21 = smov [#allocation15]  }
 0xdea   : > { %s3041_s1 = sshll.u32 %s3136_s21, 4  ;;  %s3042_s1 = int_to_ptr.vmem [resolvable:$false] %s3041_s1 }
 0xdeb   : > { %p3039_p2 = pnand %p3038_p13, %p3916_p8  ;;  %s3043_s17 = scalar_lea.vmem %s3042_s1, 256 }
 0xdec   : > { %v2265_v0 = vld [vmem:[%s3917_s28] ss:$0 sm:$0xff]  ;;  %p3044_p5 = scmp.lt.s32.totalorder %s3810_s6, %s3042_s1  ;;  %p3045_p11 = scmp.lt.s32.totalorder %s3043_s17, %s3037_s30 }
 0xded   : > { %s3808_s24 = scalar_lea.hbm %s3918_s18, %s3418_s22  ;;  %p3040_p10 = pneg %p3039_p2 }
 0xdee   : > { %p3046_p0 = por %p3045_p11, %p3044_p5 }
 0xdf0   : > { %p3047_p1 = pnand %p3046_p0, %p3040_p10 }
 0xeab   : > { %v2003_v13 = vpop.f32.mrb[20].mxu1 }
 0xeac   : > { %v2004_v22 = vadd.f32 %v2265_v0, %v2003_v13  ;;  %v2602_v23 = vpop.f32.mrb[21].mxu1 }
 0xeae   : > { %2007 = vst [vmem:[%s582_s2] sm:$0xff] %v2004_v22 }
 0xeaf   : > { %3050 = shalt.err (!%p3047_p1)
}
 0xeb0   : > { %s3051_s22 = scalar_lea.hbm %s3808_s24, 128  ;;  %s3055_s23 = scalar_lea.hbm %s3918_s18, 256 }
 0xeb1   : > { %p3052_p4 = scmp.ne.s32.totalorder %s3808_s24, %s3051_s22  ;;  %p3056_p7 = scmp.lt.u32.totalorder %s3808_s24, %s3918_s18 }
 0xeb2   : > { %p3057_p9 = scmp.lt.u32.totalorder %s3055_s23, %s3051_s22  ;;  %p3059_p13 = scmp.lt.u32.totalorder %s3051_s22, %s3808_s24 }
 0xeb3   : > { %p3053_p3 = pnand %p3052_p4, %p3916_p8 }
 0xeb4   : > { %p3058_p12 = por %p3057_p9, %p3056_p7 }
 0xeb5   : > { %p3054_p6 = pneg %p3053_p3 }
 0xeb6   : > { %p3060_p2 = por %p3059_p13, %p3058_p12 }
 0xeb8   : > { %p3061_p10 = pnand %p3060_p2, %p3054_p6 }
 0xeba   : > { %3064 = shalt.err (!%p3061_p10)
}
 0xebb   : > { %2755 = dma.vmem_to_hbm [thread:$0]  (%p3916_p8), %s3810_s6, 128, %s3808_s24, %s2010_s4  }
 0xebc PF: > { %s3919_s19 = sld [smem:[#allocation26_spill]]  ;;  %s3920_s28 = sld [smem:[#allocation24_spill]] }
 0xebd   : > { %s3921_s2 = sld [smem:[#allocation29_spill]] }
 0xec2   : > { %p2792_p5 = scmp.ge.s32.totalorder %s3919_s19, 2  ;;  %s2053_s0 = sand.u32 1, %s3920_s28  }
 0xec3   : > { %p3922_p11 = scmp.ne.s32.totalorder %s3921_s2, 0  ;;  %s2054_s29 = scalar_lea.sflag [#allocation8], %s2053_s0 }
 0xec5   : > { %p2776_p0 = pnand %p2792_p5, %p3922_p11 }
 0xec7   : > { %3096 = dma.done.wait (!%p2776_p0), %s2054_s29, 128  }
 0xec8   : > { %3098 = vsyncadd (!%p2776_p0), %s2054_s29, 4294967168  ;;  %s2063_s30 = scalar_lea.sflag [#allocation17], %s2053_s0 }
 0xec9   : > { %3100 = dma.done.wait (!%p2776_p0), %s2063_s30, 128  }
 0xeca   : > { %3102 = vsyncadd (!%p2776_p0), %s2063_s30, 4294967168  ;;  %s3923_s29 = sld [smem:[#allocation27_spill]]  ;;  %s3924_s20 = sld [smem:[#allocation25_spill]] }
 0xecb   : > { %s3925_s28 = sld [smem:[#allocation28_spill]]  ;;  %s3926_s26 = smov %s3109_s27 }
 0xed0   : > { %p39_p8 = scmp.ge.s32.totalorder %s3923_s29, 4   ;;  %s3927_s27 = smov %s3924_s20 }
 0xed2   :  { %41 = sbr.rel (!%p39_p8) target bundleno = 30 (0x1e), region = 166 }
 0xed9   :  { %2068 = vsyncpa [#allocation7], 1 }
 0xeda   :  { %2070 = vsyncpa [#allocation7 + $0x1], 1 }
 0xedb   :  { %2071 = vsyncpa [#allocation10], 1 }
 0xedc   :  { %2072 = vsyncpa [#allocation13], 1 }
 0xedd   :  { %2073 = vsyncpa [#allocation8], 1 }
 0xede   :  { %2075 = vsyncpa [#allocation8 + $0x1], 1 }
 0xedf   :  { %2076 = vsyncpa [#allocation17], 1 }
 0xee0   :  { %2078 = vsyncpa [#allocation17 + $0x1], 1 }

</bundles_post_ra>
